<compile_context>
chip_gen: v7x
topology: tpu7x:2x2x1
jax: 0.10.0
libtpu: 0.0.40
codegen_flags: <defaults>
</compile_context>

<pallas_src>
import jax
import jax.numpy as jnp
from jax.experimental import pallas as pl
from jax.experimental.pallas import tpu as pltpu

LN_EPS = 1e-5  # torch.nn.LayerNorm default eps


def _layernorm(x, gamma, beta):
    # Single-pass statistics: E[x], E[x^2] (both reductions depend only on x,
    # so the two cross-lane reductions overlap in the XLU).
    mu = jnp.mean(x, axis=-1, keepdims=True)
    ex2 = jnp.mean(x * x, axis=-1, keepdims=True)
    var = ex2 - mu * mu
    return (x - mu) * jax.lax.rsqrt(var + LN_EPS) * gamma + beta


def critic_kernel(state_ref, action_ref,
                  w1_ref, w2_ref, wa_ref,
                  p1_ref, p2_ref, wq_ref,
                  out_ref):
    bf = jnp.bfloat16

    # f32 in HBM/VMEM; cast to bf16 just before the MXU (cheap VPU op that
    # hides under the DMA) instead of a separate wrapper-side cast kernel.
    state = state_ref[...].astype(bf)       # [TB, D_in]
    action = action_ref[...].astype(bf)     # [TB, A]

    p1 = p1_ref[...]                         # f32 [3, FC1]: b1, g1, be1
    b1, g1, be1 = p1[0:1], p1[1:2], p1[2:3]
    p2 = p2_ref[...]                         # f32 [5, FC2]: b2, g2, be2, ba, bq(row)
    b2, g2, be2, ba = p2[0:1], p2[1:2], p2[2:3], p2[3:4]
    bq = p2[4:5, 0:1]                        # scalar-ish (1, 1)

    # fc1 -> LayerNorm -> relu   (bf16 MXU operands, f32 accumulation / LN)
    h1 = jnp.dot(state, w1_ref[...], preferred_element_type=jnp.float32) + b1
    h1 = _layernorm(h1, g1, be1)
    h1 = jnp.maximum(h1, 0.0)

    # fc2 -> LayerNorm   (no relu here, matches the PyTorch forward)
    h2 = jnp.dot(h1.astype(bf), w2_ref[...],
                 preferred_element_type=jnp.float32) + b2
    h2 = _layernorm(h2, g2, be2)

    # action branch: Linear -> relu
    av = jnp.dot(action, wa_ref[...], preferred_element_type=jnp.float32) + ba
    av = jnp.maximum(av, 0.0)

    # combine + relu
    sav = jnp.maximum(h2 + av, 0.0)          # f32 [TB, FC2]

    # q head on the (idle) MXU, contracting the FC2 axis of both operands so
    # the result comes out lane-dense: [8, TB] -> take row 0 -> (1, TB).
    q8 = jax.lax.dot_general(
        wq_ref[...], sav.astype(bf),
        dimension_numbers=(((1,), (1,)), ((), ())),
        preferred_element_type=jnp.float32)  # [8, TB]
    out_ref[...] = (q8[0:1, :] + bq).astype(out_ref.dtype)


def _choose_tile(batch):
    """Return (tile, padded_batch). Tile is a multiple of 128, capped at 1024."""
    padded = ((batch + 127) // 128) * 128
    for tb in (1024, 512, 256, 128):
        if padded % tb == 0:
            return tb, padded
    return 128, padded  # unreachable: padded is always a multiple of 128


@jax.jit
def critic_forward(state, action, params):
    B, d_in = state.shape
    n_act = action.shape[1]
    fc1 = params["w1"].shape[1]
    fc2 = params["w2"].shape[1]

    # Weights as bf16 (MXU-native on all generations); activations stay f32 in
    # HBM and are cast inside the kernel.
    w1 = params["w1"].astype(jnp.bfloat16)
    w2 = params["w2"].astype(jnp.bfloat16)
    wa = params["wa"].astype(jnp.bfloat16)

    # Pack the small per-feature params to cut tiny-DMA count.
    p1 = jnp.concatenate([params["b1"], params["g1"], params["be1"]],
                         axis=0)                                             # [3, FC1]
    p2 = jnp.concatenate(
        [params["b2"], params["g2"], params["be2"], params["ba"],
         jnp.broadcast_to(params["bq"].reshape(1, 1), (1, fc2))],
        axis=0)                                                              # [5, FC2]
    wq8 = jnp.broadcast_to(params["wq"].reshape(1, fc2),
                           (8, fc2)).astype(jnp.bfloat16)                    # [8, FC2]

    tb, Bp = _choose_tile(B)
    if Bp != B:
        state = jnp.pad(state, ((0, Bp - B), (0, 0)))
        action = jnp.pad(action, ((0, Bp - B), (0, 0)))

    grid = (Bp // tb,)
    const_map = lambda i: (0, 0)      # weights stay VMEM-resident across the grid
    batch_map = lambda i: (i, 0)
    out_map = lambda i: (0, i)        # lane-dense (1, tb) slabs along the batch

    out_row = pl.pallas_call(
        critic_kernel,
        out_shape=jax.ShapeDtypeStruct((1, Bp), jnp.float32),
        grid_spec=pltpu.PrefetchScalarGridSpec(
            num_scalar_prefetch=0,
            grid=grid,
            in_specs=[
                pl.BlockSpec((tb, d_in), batch_map),
                pl.BlockSpec((tb, n_act), batch_map),
                pl.BlockSpec((d_in, fc1), const_map),
                pl.BlockSpec((fc1, fc2), const_map),
                pl.BlockSpec((n_act, fc2), const_map),
                pl.BlockSpec((3, fc1), const_map),
                pl.BlockSpec((5, fc2), const_map),
                pl.BlockSpec((8, fc2), const_map),
            ],
            out_specs=pl.BlockSpec((1, tb), out_map),
        ),
        compiler_params=pltpu.CompilerParams(
            dimension_semantics=("parallel",),
        ),
    )(state, action, w1, w2, wa, p1, p2, wq8)

    # (1, Bp) -> (Bp, 1) is a pure relabeling in row-major order; drop padding.
    return out_row.reshape(Bp, 1)[:B]


def init_params(key, input_dim, fc1_dims, fc2_dims, n_actions):
    """Deterministic init mirroring the PyTorch module's __init__ (weights stored
    as [in, out], i.e. pre-transposed relative to nn.Linear)."""
    ks = jax.random.split(key, 8)

    f1 = 1.0 / jnp.sqrt(jnp.float32(fc1_dims))
    w1 = jax.random.uniform(ks[0], (input_dim, fc1_dims), jnp.float32, -f1, f1)
    b1 = jax.random.uniform(ks[1], (1, fc1_dims), jnp.float32, -f1, f1)

    f2 = 1.0 / jnp.sqrt(jnp.float32(fc2_dims))
    w2 = jax.random.uniform(ks[2], (fc1_dims, fc2_dims), jnp.float32, -f2, f2)
    b2 = jax.random.uniform(ks[3], (1, fc2_dims), jnp.float32, -f2, f2)

    fa = 1.0 / jnp.sqrt(jnp.float32(n_actions))
    wa = jax.random.uniform(ks[4], (n_actions, fc2_dims), jnp.float32, -fa, fa)
    ba = jax.random.uniform(ks[5], (1, fc2_dims), jnp.float32, -fa, fa)

    f3 = 0.003
    wq = jax.random.uniform(ks[6], (fc2_dims, 1), jnp.float32, -f3, f3)
    bq = jax.random.uniform(ks[7], (1, 1), jnp.float32, -f3, f3)

    g1 = jnp.ones((1, fc1_dims), jnp.float32)
    be1 = jnp.zeros((1, fc1_dims), jnp.float32)
    g2 = jnp.ones((1, fc2_dims), jnp.float32)
    be2 = jnp.zeros((1, fc2_dims), jnp.float32)

    return dict(w1=w1, b1=b1, g1=g1, be1=be1,
                w2=w2, b2=b2, g2=g2, be2=be2,
                wa=wa, ba=ba, wq=wq, bq=bq)


def reference_forward_f32(state, action, p):
    """Pure-f32 reference matching the PyTorch module exactly."""
    def ln(x, g, b):
        mu = jnp.mean(x, axis=-1, keepdims=True)
        var = jnp.mean((x - mu) ** 2, axis=-1, keepdims=True)
        return (x - mu) * jax.lax.rsqrt(var + LN_EPS) * g + b
    h1 = jnp.maximum(ln(state @ p["w1"] + p["b1"], p["g1"], p["be1"]), 0.0)
    h2 = ln(h1 @ p["w2"] + p["b2"], p["g2"], p["be2"])
    av = jnp.maximum(action @ p["wa"] + p["ba"], 0.0)
    sav = jnp.maximum(h2 + av, 0.0)
    return sav @ p["wq"] + p["bq"]


def reference_forward_bf16(state, action, p):
    """Pure-JAX reference mirroring the kernel's bf16-operand math (tight check)."""
    bf = jnp.bfloat16
    h1 = jnp.dot(state.astype(bf), p["w1"].astype(bf),
                 preferred_element_type=jnp.float32) + p["b1"]
    h1 = jnp.maximum(_layernorm(h1, p["g1"], p["be1"]), 0.0)
    h2 = jnp.dot(h1.astype(bf), p["w2"].astype(bf),
                 preferred_element_type=jnp.float32) + p["b2"]
    h2 = _layernorm(h2, p["g2"], p["be2"])
    av = jnp.maximum(jnp.dot(action.astype(bf), p["wa"].astype(bf),
                             preferred_element_type=jnp.float32) + p["ba"], 0.0)
    sav = jnp.maximum(h2 + av, 0.0)
    return jnp.dot(sav.astype(bf), p["wq"].astype(bf),
                   preferred_element_type=jnp.float32) + p["bq"]


if __name__ == "__main__":
    INPUT_DIM, FC1, FC2, N_ACTIONS = 16, 64, 32, 4

    key = jax.random.PRNGKey(0)
    k_state, k_action, k_params, k_big = jax.random.split(key, 4)
    params = init_params(k_params, INPUT_DIM, FC1, FC2, N_ACTIONS)

    # --- small batch (module-scale shapes; exercises the pad-to-128 path) ---
    B = 8
    state = jax.random.normal(k_state, (B, INPUT_DIM), jnp.float32)
    action = jax.random.normal(k_action, (B, N_ACTIONS), jnp.float32)

    q_kernel = jax.block_until_ready(critic_forward(state, action, params))
    assert q_kernel.shape == (B, 1)

    q_bf16 = reference_forward_bf16(state, action, params)
    q_f32 = reference_forward_f32(state, action, params)
    assert jnp.allclose(q_kernel, q_bf16, atol=5e-4, rtol=1e-3), \
        "mismatch vs bf16-matched JAX reference"
    assert jnp.allclose(q_kernel, q_f32, atol=5e-3, rtol=5e-2), \
        "mismatch vs f32 module reference"

    # --- larger batch exercises the pipelined grid (tile=1024, 8 grid steps,
    #     parallel batch axis for v7x megacore, lane-dense output slabs) ------
    BB = 8192
    kb1, kb2 = jax.random.split(k_big)
    state_b = jax.random.normal(kb1, (BB, INPUT_DIM), jnp.float32)
    action_b = jax.random.normal(kb2, (BB, N_ACTIONS), jnp.float32)

    q_big = jax.block_until_ready(critic_forward(state_b, action_b, params))
    assert q_big.shape == (BB, 1)
    q_big_ref = reference_forward_bf16(state_b, action_b, params)
    assert jnp.allclose(q_big, q_big_ref, atol=5e-4, rtol=1e-3), \
        "large-batch mismatch vs bf16-matched JAX reference"

    # --- non-multiple-of-128 batch (pad + slice path) ------------------------
    BO = 1000
    q_odd = jax.block_until_ready(
        critic_forward(state_b[:BO], action_b[:BO], params))
    assert q_odd.shape == (BO, 1)
    assert jnp.allclose(q_odd, q_big_ref[:BO], atol=5e-4, rtol=1e-3), \
        "odd-batch mismatch vs bf16-matched JAX reference"

    print("KERNEL_OK")
</pallas_src>

<mosaic_0001>
module attributes {stable_mosaic.version = 11 : i64} {
  func.func @critic_kernel(%arg0: i32, %arg1: memref<128x16xf32, #tpu.memory_space<vmem>>, %arg2: memref<128x4xf32, #tpu.memory_space<vmem>>, %arg3: memref<16x64xbf16, #tpu.memory_space<vmem>>, %arg4: memref<64x32xbf16, #tpu.memory_space<vmem>>, %arg5: memref<4x32xbf16, #tpu.memory_space<vmem>>, %arg6: memref<3x64xf32, #tpu.memory_space<vmem>>, %arg7: memref<5x32xf32, #tpu.memory_space<vmem>>, %arg8: memref<8x32xbf16, #tpu.memory_space<vmem>>, %arg9: memref<1x128xf32, #tpu.memory_space<vmem>>) attributes {dimension_semantics = [#tpu.dimension_semantics<parallel>], iteration_bounds = array<i64: 1>, scalar_prefetch = 0 : i64, scratch_operands = 0 : i64, tpu.core_type = #tpu.core_type<tc>, window_params = [{transform_indices = @transform_0, window_bounds = array<i64: 128, 16>}, {transform_indices = @transform_1, window_bounds = array<i64: 128, 4>}, {pipeline_mode = #tpu.pipeline_mode<synchronous>, transform_indices = @transform_2, window_bounds = array<i64: 16, 64>}, {pipeline_mode = #tpu.pipeline_mode<synchronous>, transform_indices = @transform_3, window_bounds = array<i64: 64, 32>}, {pipeline_mode = #tpu.pipeline_mode<synchronous>, transform_indices = @transform_4, window_bounds = array<i64: 4, 32>}, {pipeline_mode = #tpu.pipeline_mode<synchronous>, transform_indices = @transform_5, window_bounds = array<i64: 3, 64>}, {pipeline_mode = #tpu.pipeline_mode<synchronous>, transform_indices = @transform_6, window_bounds = array<i64: 5, 32>}, {pipeline_mode = #tpu.pipeline_mode<synchronous>, transform_indices = @transform_7, window_bounds = array<i64: 8, 32>}, {transform_indices = @transform_8, window_bounds = array<i64: 1, 128>}]} {
    %c0 = arith.constant 0 : index
    %c0_0 = arith.constant 0 : index
    %0 = vector.load %arg1[%c0, %c0_0] : memref<128x16xf32, #tpu.memory_space<vmem>>, vector<128x16xf32>
    %1 = arith.truncf %0 : vector<128x16xf32> to vector<128x16xbf16>
    %c0_1 = arith.constant 0 : index
    %c0_2 = arith.constant 0 : index
    %2 = vector.load %arg2[%c0_1, %c0_2] : memref<128x4xf32, #tpu.memory_space<vmem>>, vector<128x4xf32>
    %3 = arith.truncf %2 : vector<128x4xf32> to vector<128x4xbf16>
    %c0_3 = arith.constant 0 : index
    %c0_4 = arith.constant 0 : index
    %4 = vector.load %arg6[%c0_3, %c0_4] : memref<3x64xf32, #tpu.memory_space<vmem>>, vector<3x64xf32>
    %5 = vector.extract_strided_slice %4 {offsets = [0, 0], sizes = [1, 64], strides = [1, 1]} : vector<3x64xf32> to vector<1x64xf32>
    %6 = vector.extract_strided_slice %4 {offsets = [1, 0], sizes = [1, 64], strides = [1, 1]} : vector<3x64xf32> to vector<1x64xf32>
    %7 = vector.extract_strided_slice %4 {offsets = [2, 0], sizes = [1, 64], strides = [1, 1]} : vector<3x64xf32> to vector<1x64xf32>
    %c0_5 = arith.constant 0 : index
    %c0_6 = arith.constant 0 : index
    %8 = vector.load %arg7[%c0_5, %c0_6] : memref<5x32xf32, #tpu.memory_space<vmem>>, vector<5x32xf32>
    %9 = vector.extract_strided_slice %8 {offsets = [0, 0], sizes = [1, 32], strides = [1, 1]} : vector<5x32xf32> to vector<1x32xf32>
    %10 = vector.extract_strided_slice %8 {offsets = [1, 0], sizes = [1, 32], strides = [1, 1]} : vector<5x32xf32> to vector<1x32xf32>
    %11 = vector.extract_strided_slice %8 {offsets = [2, 0], sizes = [1, 32], strides = [1, 1]} : vector<5x32xf32> to vector<1x32xf32>
    %12 = vector.extract_strided_slice %8 {offsets = [3, 0], sizes = [1, 32], strides = [1, 1]} : vector<5x32xf32> to vector<1x32xf32>
    %13 = vector.extract_strided_slice %8 {offsets = [4, 0], sizes = [1, 1], strides = [1, 1]} : vector<5x32xf32> to vector<1x1xf32>
    %c0_7 = arith.constant 0 : index
    %c0_8 = arith.constant 0 : index
    %14 = vector.load %arg3[%c0_7, %c0_8] : memref<16x64xbf16, #tpu.memory_space<vmem>>, vector<16x64xbf16>
    %cst = arith.constant dense<0.000000e+00> : vector<128x64xf32>
    %15 = tpu.matmul %1, %14, %cst {dimension_numbers = #tpu.dot_dimension_numbers<[1], [0], [0], [1], [0, 0, 1, 1], [], []>} : vector<128x16xbf16>, vector<16x64xbf16>, vector<128x64xf32> -> vector<128x64xf32>
    %16 = vector.broadcast %5 : vector<1x64xf32> to vector<128x64xf32>
    %17 = arith.addf %15, %16 : vector<128x64xf32>
    %cst_9 = arith.constant dense<0.000000e+00> : vector<128xf32>
    %18 = vector.multi_reduction <add>, %17, %cst_9 [1] : vector<128x64xf32> to vector<128xf32>
    %19 = vector.shape_cast %18 : vector<128xf32> to vector<128x1xf32>
    %cst_10 = arith.constant 6.400000e+01 : f32
    %20 = vector.broadcast %cst_10 : f32 to vector<128x1xf32>
    %21 = arith.divf %19, %20 : vector<128x1xf32>
    %22 = arith.mulf %17, %17 : vector<128x64xf32>
    %cst_11 = arith.constant dense<0.000000e+00> : vector<128xf32>
    %23 = vector.multi_reduction <add>, %22, %cst_11 [1] : vector<128x64xf32> to vector<128xf32>
    %24 = vector.shape_cast %23 : vector<128xf32> to vector<128x1xf32>
    %cst_12 = arith.constant 6.400000e+01 : f32
    %25 = vector.broadcast %cst_12 : f32 to vector<128x1xf32>
    %26 = arith.divf %24, %25 : vector<128x1xf32>
    %27 = arith.mulf %21, %21 : vector<128x1xf32>
    %28 = arith.subf %26, %27 : vector<128x1xf32>
    %29 = vector.broadcast %21 : vector<128x1xf32> to vector<128x64xf32>
    %30 = arith.subf %17, %29 : vector<128x64xf32>
    %cst_13 = arith.constant 9.99999974E-6 : f32
    %31 = vector.broadcast %cst_13 : f32 to vector<128x1xf32>
    %32 = arith.addf %28, %31 : vector<128x1xf32>
    %33 = math.rsqrt %32 : vector<128x1xf32>
    %34 = vector.broadcast %33 : vector<128x1xf32> to vector<128x64xf32>
    %35 = arith.mulf %30, %34 : vector<128x64xf32>
    %36 = vector.broadcast %6 : vector<1x64xf32> to vector<128x64xf32>
    %37 = arith.mulf %35, %36 : vector<128x64xf32>
    %38 = vector.broadcast %7 : vector<1x64xf32> to vector<128x64xf32>
    %39 = arith.addf %37, %38 : vector<128x64xf32>
    %cst_14 = arith.constant 0.000000e+00 : f32
    %40 = vector.broadcast %cst_14 : f32 to vector<128x64xf32>
    %41 = arith.maximumf %39, %40 : vector<128x64xf32>
    %42 = arith.truncf %41 : vector<128x64xf32> to vector<128x64xbf16>
    %c0_15 = arith.constant 0 : index
    %c0_16 = arith.constant 0 : index
    %43 = vector.load %arg4[%c0_15, %c0_16] : memref<64x32xbf16, #tpu.memory_space<vmem>>, vector<64x32xbf16>
    %cst_17 = arith.constant dense<0.000000e+00> : vector<128x32xf32>
    %44 = tpu.matmul %42, %43, %cst_17 {dimension_numbers = #tpu.dot_dimension_numbers<[1], [0], [0], [1], [0, 0, 1, 1], [], []>} : vector<128x64xbf16>, vector<64x32xbf16>, vector<128x32xf32> -> vector<128x32xf32>
    %45 = vector.broadcast %9 : vector<1x32xf32> to vector<128x32xf32>
    %46 = arith.addf %44, %45 : vector<128x32xf32>
    %cst_18 = arith.constant dense<0.000000e+00> : vector<128xf32>
    %47 = vector.multi_reduction <add>, %46, %cst_18 [1] : vector<128x32xf32> to vector<128xf32>
    %48 = vector.shape_cast %47 : vector<128xf32> to vector<128x1xf32>
    %cst_19 = arith.constant 3.200000e+01 : f32
    %49 = vector.broadcast %cst_19 : f32 to vector<128x1xf32>
    %50 = arith.divf %48, %49 : vector<128x1xf32>
    %51 = arith.mulf %46, %46 : vector<128x32xf32>
    %cst_20 = arith.constant dense<0.000000e+00> : vector<128xf32>
    %52 = vector.multi_reduction <add>, %51, %cst_20 [1] : vector<128x32xf32> to vector<128xf32>
    %53 = vector.shape_cast %52 : vector<128xf32> to vector<128x1xf32>
    %cst_21 = arith.constant 3.200000e+01 : f32
    %54 = vector.broadcast %cst_21 : f32 to vector<128x1xf32>
    %55 = arith.divf %53, %54 : vector<128x1xf32>
    %56 = arith.mulf %50, %50 : vector<128x1xf32>
    %57 = arith.subf %55, %56 : vector<128x1xf32>
    %58 = vector.broadcast %50 : vector<128x1xf32> to vector<128x32xf32>
    %59 = arith.subf %46, %58 : vector<128x32xf32>
    %cst_22 = arith.constant 9.99999974E-6 : f32
    %60 = vector.broadcast %cst_22 : f32 to vector<128x1xf32>
    %61 = arith.addf %57, %60 : vector<128x1xf32>
    %62 = math.rsqrt %61 : vector<128x1xf32>
    %63 = vector.broadcast %62 : vector<128x1xf32> to vector<128x32xf32>
    %64 = arith.mulf %59, %63 : vector<128x32xf32>
    %65 = vector.broadcast %10 : vector<1x32xf32> to vector<128x32xf32>
    %66 = arith.mulf %64, %65 : vector<128x32xf32>
    %67 = vector.broadcast %11 : vector<1x32xf32> to vector<128x32xf32>
    %68 = arith.addf %66, %67 : vector<128x32xf32>
    %c0_23 = arith.constant 0 : index
    %c0_24 = arith.constant 0 : index
    %69 = vector.load %arg5[%c0_23, %c0_24] : memref<4x32xbf16, #tpu.memory_space<vmem>>, vector<4x32xbf16>
    %cst_25 = arith.constant dense<0.000000e+00> : vector<128x32xf32>
    %70 = tpu.matmul %3, %69, %cst_25 {dimension_numbers = #tpu.dot_dimension_numbers<[1], [0], [0], [1], [0, 0, 1, 1], [], []>} : vector<128x4xbf16>, vector<4x32xbf16>, vector<128x32xf32> -> vector<128x32xf32>
    %71 = vector.broadcast %12 : vector<1x32xf32> to vector<128x32xf32>
    %72 = arith.addf %70, %71 : vector<128x32xf32>
    %cst_26 = arith.constant 0.000000e+00 : f32
    %73 = vector.broadcast %cst_26 : f32 to vector<128x32xf32>
    %74 = arith.maximumf %72, %73 : vector<128x32xf32>
    %75 = arith.addf %68, %74 : vector<128x32xf32>
    %cst_27 = arith.constant 0.000000e+00 : f32
    %76 = vector.broadcast %cst_27 : f32 to vector<128x32xf32>
    %77 = arith.maximumf %75, %76 : vector<128x32xf32>
    %c0_28 = arith.constant 0 : index
    %c0_29 = arith.constant 0 : index
    %78 = vector.load %arg8[%c0_28, %c0_29] : memref<8x32xbf16, #tpu.memory_space<vmem>>, vector<8x32xbf16>
    %79 = arith.truncf %77 : vector<128x32xf32> to vector<128x32xbf16>
    %cst_30 = arith.constant dense<0.000000e+00> : vector<8x128xf32>
    %80 = tpu.matmul %78, %79, %cst_30 {dimension_numbers = #tpu.dot_dimension_numbers<[1], [1], [0], [0], [0, 0, 1, 0], [], []>} : vector<8x32xbf16>, vector<128x32xbf16>, vector<8x128xf32> -> vector<8x128xf32>
    %81 = vector.extract_strided_slice %80 {offsets = [0, 0], sizes = [1, 128], strides = [1, 1]} : vector<8x128xf32> to vector<1x128xf32>
    %82 = vector.broadcast %13 : vector<1x1xf32> to vector<1x128xf32>
    %83 = arith.addf %81, %82 : vector<1x128xf32>
    %c0_31 = arith.constant 0 : index
    %c0_32 = arith.constant 0 : index
    %84 = vector.load %arg9[%c0_31, %c0_32] : memref<1x128xf32, #tpu.memory_space<vmem>>, vector<1x128xf32>
    tpu.vector_store %arg9[%c0_31, %c0_32], %83 {strides = array<i32>} : memref<1x128xf32, #tpu.memory_space<vmem>>, vector<1x128xf32>,
    return
  }
  func.func @transform_0(%arg0: i32) -> (i32, i32) {
    %c0_i32 = arith.constant 0 : i32
    %c0_i32_0 = arith.constant 0 : i32
    return %arg0, %c0_i32 : i32, i32
  }
  func.func @transform_1(%arg0: i32) -> (i32, i32) {
    %c0_i32 = arith.constant 0 : i32
    %c0_i32_0 = arith.constant 0 : i32
    return %arg0, %c0_i32 : i32, i32
  }
  func.func @transform_2(%arg0: i32) -> (i32, i32) {
    %c0_i32 = arith.constant 0 : i32
    %c0_i32_0 = arith.constant 0 : i32
    %c0_i32_1 = arith.constant 0 : i32
    return %c0_i32, %c0_i32_0 : i32, i32
  }
  func.func @transform_3(%arg0: i32) -> (i32, i32) {
    %c0_i32 = arith.constant 0 : i32
    %c0_i32_0 = arith.constant 0 : i32
    %c0_i32_1 = arith.constant 0 : i32
    return %c0_i32, %c0_i32_0 : i32, i32
  }
  func.func @transform_4(%arg0: i32) -> (i32, i32) {
    %c0_i32 = arith.constant 0 : i32
    %c0_i32_0 = arith.constant 0 : i32
    %c0_i32_1 = arith.constant 0 : i32
    return %c0_i32, %c0_i32_0 : i32, i32
  }
  func.func @transform_5(%arg0: i32) -> (i32, i32) {
    %c0_i32 = arith.constant 0 : i32
    %c0_i32_0 = arith.constant 0 : i32
    %c0_i32_1 = arith.constant 0 : i32
    return %c0_i32, %c0_i32_0 : i32, i32
  }
  func.func @transform_6(%arg0: i32) -> (i32, i32) {
    %c0_i32 = arith.constant 0 : i32
    %c0_i32_0 = arith.constant 0 : i32
    %c0_i32_1 = arith.constant 0 : i32
    return %c0_i32, %c0_i32_0 : i32, i32
  }
  func.func @transform_7(%arg0: i32) -> (i32, i32) {
    %c0_i32 = arith.constant 0 : i32
    %c0_i32_0 = arith.constant 0 : i32
    %c0_i32_1 = arith.constant 0 : i32
    return %c0_i32, %c0_i32_0 : i32, i32
  }
  func.func @transform_8(%arg0: i32) -> (i32, i32) {
    %c0_i32 = arith.constant 0 : i32
    %c0_i32_0 = arith.constant 0 : i32
    return %c0_i32, %arg0 : i32, i32
  }
}

</mosaic_0001>

<bundles_post_ra>
// kernel: critic_forward.1
= control target key start
LH: loop header
LB: loop body
LE: loop exit
PB: predicated region body
PF: predicated region fallthrough
CT: control target
= control target key end

     0   :  { %vm92_vm0 = vcmask 130048   ;;  %v82_v25 = vlaneseq  ;;  %vm214_vm1 = vcmask 523264   ;;  %vm989_vm2 = vcmask 1041408   ;;  %s2265_s2 = inlined_call_operand.vmem [shape: bf16[16,64], index: 2, kind: input, shape index: {}]   ;;  %s2266_s0 = inlined_call_operand.vmem [shape: f32[128,16], index: 0, kind: input, shape index: {}]   ;;  %s2267_s5 = inlined_call_operand.vmem [shape: f32[3,64], index: 5, kind: input, shape index: {}]   ;;  %s2268_s3 = inlined_call_operand.vmem [shape: bf16[64,32], index: 3, kind: input, shape index: {}]   ;;  %s2269_s4 = inlined_call_operand.vmem [shape: bf16[4,32], index: 4, kind: input, shape index: {}]   ;;  %s2270_s1 = inlined_call_operand.vmem [shape: f32[128,4], index: 1, kind: input, shape index: {}]   ;;  %s2271_s6 = inlined_call_operand.vmem [shape: f32[5,32], index: 6, kind: input, shape index: {}]   ;;  %s2272_s7 = inlined_call_operand.vmem [shape: bf16[8,32], index: 7, kind: input, shape index: {}]   ;;  %s2273_s8 = inlined_call_operand.vmem [shape: f32[1,128], index: 8, kind: output, shape index: {}]  }
   0x1   :  { %v1380_v0 = vld [vmem:[%s2265_s2] sm:$0xff]   ;;  %v31_v2 = vld [vmem:[%s2266_s0 + $0x8] sm:$0xff]  ;;  %v32_v3 = vld [vmem:[%s2266_s0 + $0x10] sm:$0xff]  ;;  %vm964_vm3 = vcmask 31744   ;;  %vm677_vm4 = vcmask 261120   ;;  %vm1450_vm5 = vmmov 0  }
   0x2   :  { %v30_v1 = vld [vmem:[%s2266_s0] sm:$0xff]  ;;  %1295 = vmatprep.subr.bf16.mxu0 %v1380_v0  ;;  %v33_v5 = vld [vmem:[%s2266_s0 + $0x18] sm:$0xff]  ;;  %v35_v7 = vld [vmem:[%s2266_s0 + $0x28] sm:$0xff]  ;;  %v1556_v26 = vshrl.u32 %v82_v25, 7 }
   0x3   :  { %v46_v4 = vpack.c.bf16 %v31_v2, %v30_v1  ;;  %v34_v6 = vld [vmem:[%s2266_s0 + $0x20] sm:$0xff]  ;;  %1296 = vmatpush3.bf16.msra.mxu0 %v1380_v0  ;;  %v47_v8 = vpack.c.bf16 %v33_v5, %v32_v3  ;;  %v36_v10 = vld [vmem:[%s2266_s0 + $0x30] sm:$0xff]  ;;  %v37_v11 = vld [vmem:[%s2266_s0 + $0x38] sm:$0xff] }
   0x4   :  { %v48_v9 = vpack.c.bf16 %v35_v7, %v34_v6  ;;  %v38_v12 = vld [vmem:[%s2266_s0 + $0x40] sm:$0xff]  ;;  %v39_v13 = vld [vmem:[%s2266_s0 + $0x48] sm:$0xff]  ;;  %v49_v14 = vpack.c.bf16 %v37_v11, %v36_v10  ;;  %v40_v16 = vld [vmem:[%s2266_s0 + $0x50] sm:$0xff]  ;;  %v84_v27 = vsub.s32 0, %v1556_v26 }
   0x5   :  { %1297 = vmatprep.mubr.msk.bf16.mxu0 %vm92_vm0, %v46_v4  ;;  %v50_v15 = vpack.c.bf16 %v39_v13, %v38_v12  ;;  %v41_v17 = vld [vmem:[%s2266_s0 + $0x58] sm:$0xff]  ;;  %v42_v18 = vld [vmem:[%s2266_s0 + $0x60] sm:$0xff]  ;;  %v43_v19 = vld [vmem:[%s2266_s0 + $0x68] sm:$0xff] }
   0x6   :  { %1298 = vmatmul.mubr.msk.bf16.vlgmr.msra.gmra.mrb[0].mxu0 %vm92_vm0, %v47_v8  ;;  %v51_v20 = vpack.c.bf16 %v41_v17, %v40_v16  ;;  %v52_v21 = vpack.c.bf16 %v43_v19, %v42_v18  ;;  %v44_v22 = vld [vmem:[%s2266_s0 + $0x70] sm:$0xff]  ;;  %v45_v23 = vld [vmem:[%s2266_s0 + $0x78] sm:$0xff]  ;;  %v1562_v28 = vld [vmem:[%s2267_s5] sm:$0x7] }
   0x7   :  { %1301 = vmatprep.mubr.msk.bf16.mxu0 %vm92_vm0, %v48_v9  ;;  %v53_v24 = vpack.c.bf16 %v45_v23, %v44_v22  ;;  %v1567_v29 = vrot.slane %v1562_v28, %v84_v27 }
   0xe   :  { %1302 = vmatmul.mubr.msk.bf16.gmra.mrb[4].mxu0 %vm92_vm0, %v49_v14 }
   0xf   :  { %1305 = vmatprep.mubr.msk.bf16.mxu0 %vm92_vm0, %v50_v15 }
  0x16   :  { %1306 = vmatmul.mubr.msk.bf16.gmra.mrb[8].mxu0 %vm92_vm0, %v51_v20 }
  0x17   :  { %1309 = vmatprep.mubr.msk.bf16.mxu0 %vm92_vm0, %v52_v21 }
  0x1e   :  { %1310 = vmatmul.mubr.msk.bf16.gmra.mrb[12].mxu0 %vm92_vm0, %v53_v24  ;;  %v1381_v24 = vld [vmem:[%s2268_s3] sm:$0xff]  }
  0x1f   :  { %1313 = vmatprep.subr.bf16.mxu1 %v1381_v24 }
  0x20   :  { %1314 = vmatpush3.bf16.msra.mxu1 %v1381_v24 }
  0xd9   :  { %v1299_v30 = vpop.f32.mrb[0].mxu0 }
  0xda   :  { %v1570_v31 = vadd.f32 %v1299_v30, %v1567_v29  ;;  %v151_v32 = vpop.f32.mrb[1].mxu0 }
  0xdb   :  { %v1573_v33 = vadd.f32 %v151_v32, %v1567_v29  ;;  %v1300_v34 = vpop.f32.mrb[2].mxu0 }
  0xdc   :  { %v1576_v35 = vadd.f32 %v1300_v34, %v1567_v29  ;;  %v154_v36 = vpop.f32.mrb[3].mxu0  ;;  %v221_v37 = vsel %vm214_vm1, %v1570_v31, 0.0  ;;  %v282_v51 = vmul.f32 %v1570_v31, %v1570_v31 }
  0xdd   :  { %v1581_v38 = vadd.f32 %v154_v36, %v1567_v29  ;;  %222 = vadd.xlane.f32.xlu1 %v221_v37  ;;  %v215_v39 = vsel %vm214_vm1, %v1573_v33, 0.0  ;;  %v280_v44 = vmul.f32 %v1573_v33, %v1573_v33  ;;  %v1382_v36 = vld [vmem:[%s2268_s3 + $0x8] sm:$0xff]  }
  0xde   :  { %216 = vadd.xlane.f32.xlu0 %v215_v39  ;;  %v224_v40 = vsel %vm214_vm1, %v1576_v35, 0.0  ;;  %v283_v49 = vmul.f32 %v1576_v35, %v1576_v35  ;;  %v302_v55 = vsel %vm214_vm1, %v282_v51, 0.0  ;;  %1315 = vmatprep.subr.bf16.mxu1 %v1382_v36 }
  0xdf   :  { %v281_v41 = vmul.f32 %v1581_v38, %v1581_v38  ;;  %v218_v42 = vsel %vm214_vm1, %v1581_v38, 0.0  ;;  %v296_v50 = vsel %vm214_vm1, %v280_v44, 0.0  ;;  %1316 = vmatpush3.bf16.msra.mxu1 %v1382_v36 }
  0xe0   :  { %v305_v53 = vsel %vm214_vm1, %v283_v49, 0.0 }
  0xe1   :  { %225 = vadd.xlane.f32.xlu1 %v224_v40  ;;  %v1303_v43 = vpop.f32.mrb[4].mxu0  ;;  %v299_v47 = vsel %vm214_vm1, %v281_v41, 0.0 }
  0xe2   :  { %219 = vadd.xlane.f32.xlu0 %v218_v42  ;;  %v167_v45 = vpop.f32.mrb[5].mxu0  ;;  %v1604_v54 = vadd.f32 %v1303_v43, %v1567_v29  ;;  %v1383_v42 = vld [vmem:[%s2268_s3 + $0x10] sm:$0xff]  }
  0xe3   :  { %v1304_v46 = vpop.f32.mrb[6].mxu0  ;;  %v1613_v62 = vadd.f32 %v167_v45, %v1567_v29  ;;  %1317 = vmatprep.subr.bf16.mxu1 %v1383_v42 }
  0xe4   :  { %v170_v48 = vpop.f32.mrb[7].mxu0  ;;  %v1600_v52 = vadd.f32 %v1304_v46, %v1567_v29  ;;  %v233_v63 = vsel %vm214_vm1, %v1604_v54, 0.0  ;;  %v286_v11 = vmul.f32 %v1604_v54, %v1604_v54  ;;  %1318 = vmatpush3.bf16.msra.mxu1 %v1383_v42 }
  0xe5   :  { %300 = vadd.xlane.f32.xlu1 %v299_v47  ;;  %v1610_v60 = vadd.f32 %v170_v48, %v1567_v29  ;;  %v227_v2 = vsel %vm214_vm1, %v1613_v62, 0.0  ;;  %v284_v3 = vmul.f32 %v1613_v62, %v1613_v62  ;;  %v1384_v47 = vld [vmem:[%s2268_s3 + $0x18] sm:$0xff]  }
  0xe6   :  { %297 = vadd.xlane.f32.xlu0 %v296_v50  ;;  %v236_v57 = vsel %vm214_vm1, %v1600_v52, 0.0  ;;  %v287_v8 = vmul.f32 %v1600_v52, %v1600_v52  ;;  %v314_v15 = vsel %vm214_vm1, %v286_v11, 0.0  ;;  %1319 = vmatprep.subr.bf16.mxu1 %v1384_v47  ;;  %v63_v11 = vld [vmem:[%s2270_s1 + $0x48] sm:$0xff] }
  0xe7   :  { %v230_v0 = vsel %vm214_vm1, %v1610_v60, 0.0  ;;  %v285_v1 = vmul.f32 %v1610_v60, %v1610_v60  ;;  %v308_v10 = vsel %vm214_vm1, %v284_v3, 0.0  ;;  %v57_v3 = vld [vmem:[%s2270_s1 + $0x18] sm:$0xff] }
  0xe8   :  { %v317_v13 = vsel %vm214_vm1, %v287_v8, 0.0  ;;  %1320 = vmatpush3.bf16.msra.mxu1 %v1384_v47  ;;  %v60_v8 = vld [vmem:[%s2270_s1 + $0x30] sm:$0xff] }
  0xe9   :  { %306 = vadd.xlane.f32.xlu1 %v305_v53  ;;  %v1307_v56 = vpop.f32.mrb[8].mxu0  ;;  %v311_v7 = vsel %vm214_vm1, %v285_v1, 0.0 }
  0xea   :  { %303 = vadd.xlane.f32.xlu0 %v302_v55  ;;  %v183_v58 = vpop.f32.mrb[9].mxu0  ;;  %v1636_v14 = vadd.f32 %v1307_v56, %v1567_v29 }
  0xeb   :  { %v1308_v59 = vpop.f32.mrb[10].mxu0  ;;  %v1645_v18 = vadd.f32 %v183_v58, %v1567_v29 }
  0xec   :  { %v186_v61 = vpop.f32.mrb[11].mxu0  ;;  %v1632_v12 = vadd.f32 %v1308_v59, %v1567_v29  ;;  %v245_v19 = vsel %vm214_vm1, %v1636_v14, 0.0  ;;  %v290_v34 = vmul.f32 %v1636_v14, %v1636_v14  ;;  %v959_v59 = vld [vmem:[%s2269_s4] sm:$0x3] }
  0xed   :  { %237 = vadd.xlane.f32.xlu1 %v236_v57  ;;  %v1642_v17 = vadd.f32 %v186_v61, %v1567_v29  ;;  %v239_v22 = vsel %vm214_vm1, %v1645_v18, 0.0  ;;  %v288_v23 = vmul.f32 %v1645_v18, %v1645_v18  ;;  %v54_v61 = vld [vmem:[%s2270_s1] sm:$0xff]  ;;  %1375 = vmatprep.subr.msk.bf16.mxu0 %vm989_vm2, %v959_v59 }
  0xee   :  { %234 = vadd.xlane.f32.xlu0 %v233_v63  ;;  %v248_v16 = vsel %vm214_vm1, %v1632_v12, 0.0  ;;  %v291_v30 = vmul.f32 %v1632_v12, %v1632_v12  ;;  %v326_v41 = vsel %vm214_vm1, %v290_v34, 0.0  ;;  %v55_v63 = vld [vmem:[%s2270_s1 + $0x8] sm:$0xff] }
  0xef   :  { %v242_v20 = vsel %vm214_vm1, %v1642_v17, 0.0  ;;  %v289_v21 = vmul.f32 %v1642_v17, %v1642_v17  ;;  %v320_v32 = vsel %vm214_vm1, %v288_v23, 0.0  ;;  %v70_v1 = vpack.c.bf16 %v55_v63, %v54_v61 }
  0xf0   :  { %v329_v39 = vsel %vm214_vm1, %v291_v30, 0.0 }
  0xf1   :  { %231 = vadd.xlane.f32.xlu1 %v230_v0  ;;  %v1311_v4 = vpop.f32.mrb[12].mxu0  ;;  %v323_v25 = vsel %vm214_vm1, %v289_v21, 0.0  ;;  %v991_v0 = vsel %vm989_vm2, %v959_v59, 0  ;;  %1339 = vmatprep.mubr.msk.bf16.mxu0 %vm964_vm3, %v70_v1 }
  0xf2   :  { %228 = vadd.xlane.f32.xlu0 %v227_v2  ;;  %v199_v5 = vpop.f32.mrb[13].mxu0  ;;  %v1674_v40 = vadd.f32 %v1311_v4, %v1567_v29  ;;  %v56_v2 = vld [vmem:[%s2270_s1 + $0x10] sm:$0xff]  ;;  %v58_v4 = vld [vmem:[%s2270_s1 + $0x20] sm:$0xff]  ;;  %1338 = vmatpush3.bf16.msra.mxu0 %v991_v0 }
  0xf3   :  { %v1312_v6 = vpop.f32.mrb[14].mxu0  ;;  %v1686_v45 = vadd.f32 %v199_v5, %v1567_v29  ;;  %v71_v5 = vpack.c.bf16 %v57_v3, %v56_v2  ;;  %v458_v2 = vsub.s32 1, %v1556_v26 }
  0xf4   :  { %v202_v9 = vpop.f32.mrb[15].mxu0  ;;  %v1670_v37 = vadd.f32 %v1312_v6, %v1567_v29  ;;  %v257_v46 = vsel %vm214_vm1, %v1674_v40, 0.0  ;;  %v294_v56 = vmul.f32 %v1674_v40, %v1674_v40  ;;  %v59_v6 = vld [vmem:[%s2270_s1 + $0x28] sm:$0xff] }
  0xf5   :  { %312 = vadd.xlane.f32.xlu1 %v311_v7  ;;  %v1683_v44 = vadd.f32 %v202_v9, %v1567_v29  ;;  %v251_v29 = vsel %vm214_vm1, %v1686_v45, 0.0  ;;  %v292_v50 = vmul.f32 %v1686_v45, %v1686_v45  ;;  %v72_v7 = vpack.c.bf16 %v59_v6, %v58_v4  ;;  %1340 = vmatmul.mubr.msk.bf16.vlgmr.msra.gmra.mrb[16].mxu0 %vm964_vm3, %v71_v5  ;;  %v61_v9 = vld [vmem:[%s2270_s1 + $0x38] sm:$0xff] }
  0xf6   :  { %309 = vadd.xlane.f32.xlu0 %v308_v10  ;;  %v260_v43 = vsel %vm214_vm1, %v1670_v37, 0.0  ;;  %v295_v53 = vmul.f32 %v1670_v37, %v1670_v37  ;;  %v338_v58 = vsel %vm214_vm1, %v294_v56, 0.0  ;;  %v62_v10 = vld [vmem:[%s2270_s1 + $0x40] sm:$0xff] }
  0xf7   :  { %v254_v48 = vsel %vm214_vm1, %v1683_v44, 0.0  ;;  %v293_v49 = vmul.f32 %v1683_v44, %v1683_v44  ;;  %v332_v55 = vsel %vm214_vm1, %v292_v50, 0.0  ;;  %1343 = vmatprep.mubr.msk.bf16.mxu0 %vm964_vm3, %v72_v7  ;;  %v478_v7 = vsub.s32 2, %v1556_v26 }
  0xf8   :  { %v341_v57 = vsel %vm214_vm1, %v295_v53, 0.0 }
  0xf9   :  { %318 = vadd.xlane.f32.xlu1 %v317_v13  ;;  %v335_v51 = vsel %vm214_vm1, %v293_v49, 0.0  ;;  %v73_v13 = vpack.c.bf16 %v61_v9, %v60_v8  ;;  %v1771_v8 = vrot.slane %v1562_v28, %v458_v2 }
  0xfa   :  { %315 = vadd.xlane.f32.xlu0 %v314_v15  ;;  %v74_v15 = vpack.c.bf16 %v63_v11, %v62_v10 }
  0xfd   :  { %249 = vadd.xlane.f32.xlu1 %v248_v16  ;;  %1344 = vmatmul.mubr.msk.bf16.gmra.mrb[20].mxu0 %vm964_vm3, %v73_v13  ;;  %v64_v16 = vld [vmem:[%s2270_s1 + $0x50] sm:$0xff] }
  0xfe   :  { %246 = vadd.xlane.f32.xlu0 %v245_v19  ;;  %1347 = vmatprep.mubr.msk.bf16.mxu0 %vm964_vm3, %v74_v15  ;;  %v65_v19 = vld [vmem:[%s2270_s1 + $0x58] sm:$0xff] }
 0x101   :  { %243 = vadd.xlane.f32.xlu1 %v242_v20  ;;  %v75_v20 = vpack.c.bf16 %v65_v19, %v64_v16 }
 0x102   :  { %240 = vadd.xlane.f32.xlu0 %v239_v22 }
 0x105   :  { %324 = vadd.xlane.f32.xlu1 %v323_v25  ;;  %1348 = vmatmul.mubr.msk.bf16.gmra.mrb[24].mxu0 %vm964_vm3, %v75_v20 }
 0x106   :  { %321 = vadd.xlane.f32.xlu0 %v320_v32 }
 0x109   :  { %330 = vadd.xlane.f32.xlu1 %v329_v39 }
 0x10a   :  { %327 = vadd.xlane.f32.xlu0 %v326_v41 }
 0x10d   :  { %261 = vadd.xlane.f32.xlu1 %v260_v43 }
 0x10e   :  { %258 = vadd.xlane.f32.xlu0 %v257_v46 }
 0x111   :  { %255 = vadd.xlane.f32.xlu1 %v254_v48 }
 0x112   :  { %252 = vadd.xlane.f32.xlu0 %v251_v29 }
 0x115   :  { %336 = vadd.xlane.f32.xlu1 %v335_v51 }
 0x116   :  { %333 = vadd.xlane.f32.xlu0 %v332_v55 }
 0x119   :  { %342 = vadd.xlane.f32.xlu1 %v341_v57 }
 0x11a   :  { %339 = vadd.xlane.f32.xlu0 %v338_v58 }
 0x16a   :  { %v223_v21 = vpop.xlane.xlu1 %222 }
 0x16b   :  { %v217_v22 = vpop.xlane.xlu0 %216  ;;  %v1756_v42 = vmul.f32 0.015625, %v223_v21 }
 0x16c   :  { %v264_v25 = vmul.f32 0.015625, %v217_v22 }
 0x16d   :  { %v362_v55 = vmul.f32 %v1756_v42, %v1756_v42 }
 0x16e   :  { %v226_v23 = vpop.xlane.xlu1 %225  ;;  %v360_v43 = vmul.f32 %v264_v25, %v264_v25  ;;  %v392_v15 = vsub.f32 %v1573_v33, %v264_v25  ;;  %v394_v33 = vsub.f32 %v1570_v31, %v1756_v42 }
 0x16f   :  { %v220_v24 = vpop.xlane.xlu0 %219  ;;  %v1754_v36 = vmul.f32 0.015625, %v226_v23 }
 0x170   :  { %v265_v30 = vmul.f32 0.015625, %v220_v24 }
 0x171   :  { %v363_v29 = vmul.f32 %v1754_v36, %v1754_v36 }
 0x172   :  { %v361_v32 = vmul.f32 %v265_v30, %v265_v30  ;;  %v301_v34 = vpop.xlane.xlu1 %300  ;;  %v393_v9 = vsub.f32 %v1581_v38, %v265_v30  ;;  %v1786_v38 = vrot.slane %v1562_v28, %v478_v7 }
 0x173   :  { %v345_v39 = vmul.f32 0.015625, %v301_v34  ;;  %v298_v41 = vpop.xlane.xlu0 %297  ;;  %v395_v34 = vsub.f32 %v1576_v35, %v1754_v36 }
 0x174   :  { %v344_v46 = vmul.f32 0.015625, %v298_v41 }
 0x175   :  { %v377_v47 = vsub.f32 %v345_v39, %v361_v32 }
 0x176   :  { %v376_v48 = vsub.f32 %v344_v46, %v360_v43  ;;  %v307_v49 = vpop.xlane.xlu1 %306 }
 0x177   :  { %v409_v50 = vadd.f32 1e-05, %v377_v47  ;;  %v347_v51 = vmul.f32 0.015625, %v307_v49  ;;  %v304_v53 = vpop.xlane.xlu0 %303 }
 0x178   :  { %v408_v56 = vadd.f32 1e-05, %v376_v48  ;;  %v346_v57 = vmul.f32 0.015625, %v304_v53 }
 0x179   :  { %1385 = vrsqrt.f32 %v409_v50  ;;  %v379_v58 = vsub.f32 %v347_v51, %v363_v29 }
 0x17a   :  { %1387 = vrsqrt.f32 %v408_v56  ;;  %v378_v59 = vsub.f32 %v346_v57, %v362_v55  ;;  %v238_v61 = vpop.xlane.xlu1 %237 }
 0x17b   :  { %v411_v63 = vadd.f32 1e-05, %v379_v58  ;;  %v235_v0 = vpop.xlane.xlu0 %234  ;;  %v1774_v10 = vmul.f32 0.015625, %v238_v61 }
 0x17c   :  { %v410_v1 = vadd.f32 1e-05, %v378_v59  ;;  %v1777_v16 = vmul.f32 0.015625, %v235_v0 }
 0x17d   :  { %1389 = vrsqrt.f32 %v411_v63  ;;  %v367_v39 = vmul.f32 %v1774_v10, %v1774_v10 }
 0x17e   :  { %1391 = vrsqrt.f32 %v410_v1  ;;  %v232_v3 = vpop.xlane.xlu1 %231  ;;  %v366_v28 = vmul.f32 %v1777_v16, %v1777_v16 }
 0x17f   :  { %v1763_v4 = vmul.f32 0.015625, %v232_v3  ;;  %v229_v5 = vpop.xlane.xlu0 %228 }
 0x180   :  { %v1765_v6 = vmul.f32 0.015625, %v229_v5 }
 0x181   :  { %v365_v19 = vmul.f32 %v1763_v4, %v1763_v4 }
 0x182   :  { %v313_v11 = vpop.xlane.xlu1 %312  ;;  %v364_v23 = vmul.f32 %v1765_v6, %v1765_v6 }
 0x183   :  { %v1386_v13 = vpop.eup %1385  ;;  %v349_v20 = vmul.f32 0.015625, %v313_v11  ;;  %v310_v21 = vpop.xlane.xlu0 %309 }
 0x184   :  { %v1388_v22 = vpop.eup %1387  ;;  %v348_v24 = vmul.f32 0.015625, %v310_v21  ;;  %v441_v32 = vmul.f32 %v1386_v13, %v393_v9 }
 0x185   :  { %v381_v25 = vsub.f32 %v349_v20, %v365_v19  ;;  %v440_v30 = vmul.f32 %v1388_v22, %v392_v15 }
 0x186   :  { %v380_v41 = vsub.f32 %v348_v24, %v364_v23  ;;  %v319_v43 = vpop.xlane.xlu1 %318  ;;  %v461_v46 = vmul.f32 %v1771_v8, %v441_v32  ;;  %v397_v24 = vsub.f32 %v1610_v60, %v1763_v4 }
 0x187   :  { %v1390_v47 = vpop.eup %1389  ;;  %v413_v48 = vadd.f32 1e-05, %v381_v25  ;;  %v351_v49 = vmul.f32 0.015625, %v319_v43  ;;  %v316_v29 = vpop.xlane.xlu0 %315  ;;  %v460_v31 = vmul.f32 %v1771_v8, %v440_v30 }
 0x188   :  { %v1392_v42 = vpop.eup %1391  ;;  %v412_v50 = vadd.f32 1e-05, %v380_v41  ;;  %v350_v51 = vmul.f32 0.015625, %v316_v29  ;;  %v481_v35 = vadd.f32 %v1786_v38, %v461_v46  ;;  %v443_v36 = vmul.f32 %v1390_v47, %v395_v34 }
 0x189   :  { %1393 = vrsqrt.f32 %v413_v48  ;;  %v383_v53 = vsub.f32 %v351_v49, %v367_v39  ;;  %v480_v55 = vadd.f32 %v1786_v38, %v460_v31  ;;  %v442_v56 = vmul.f32 %v1392_v42, %v394_v33 }
 0x18a   :  { %1395 = vrsqrt.f32 %v412_v50  ;;  %v382_v57 = vsub.f32 %v350_v51, %v366_v28  ;;  %v250_v58 = vpop.xlane.xlu1 %249  ;;  %v497_v59 = vmax.f32 %v481_v35, 0.0  ;;  %v463_v61 = vmul.f32 %v1771_v8, %v443_v36 }
 0x18b   :  { %v415_v63 = vadd.f32 1e-05, %v383_v53  ;;  %v247_v0 = vpop.xlane.xlu0 %246  ;;  %v496_v1 = vmax.f32 %v480_v55, 0.0  ;;  %v462_v3 = vmul.f32 %v1771_v8, %v442_v56  ;;  %v1811_v32 = vmul.f32 0.015625, %v250_v58 }
 0x18c   :  { %v414_v5 = vadd.f32 1e-05, %v382_v57  ;;  %v483_v9 = vadd.f32 %v1786_v38, %v463_v61  ;;  %v396_v34 = vsub.f32 %v1613_v62, %v1765_v6  ;;  %v1815_v39 = vmul.f32 0.015625, %v247_v0 }
 0x18d   :  { %1397 = vrsqrt.f32 %v415_v63  ;;  %v512_v11 = vpack.c.bf16 %v497_v59, %v496_v1  ;;  %v482_v15 = vadd.f32 %v1786_v38, %v462_v3  ;;  %v399_v48 = vsub.f32 %v1600_v52, %v1774_v10 }
 0x18e   :  { %1399 = vrsqrt.f32 %v414_v5  ;;  %v244_v13 = vpop.xlane.xlu1 %243  ;;  %v499_v21 = vmax.f32 %v483_v9, 0.0  ;;  %v398_v6 = vsub.f32 %v1604_v54, %v1777_v16  ;;  %v371_v29 = vmul.f32 %v1811_v32, %v1811_v32 }
 0x18f   :  { %v1804_v19 = vmul.f32 0.015625, %v244_v13  ;;  %1321 = vmatprep.mubr.msk.bf16.mxu1 %vm214_vm1, %v512_v11  ;;  %v241_v20 = vpop.xlane.xlu0 %240  ;;  %v498_v23 = vmax.f32 %v482_v15, 0.0  ;;  %v370_v35 = vmul.f32 %v1815_v39, %v1815_v39 }
 0x190   :  { %v1807_v22 = vmul.f32 0.015625, %v241_v20 }
 0x191   :  { %v513_v25 = vpack.c.bf16 %v499_v21, %v498_v23  ;;  %v369_v41 = vmul.f32 %v1804_v19, %v1804_v19 }
 0x192   :  { %v325_v33 = vpop.xlane.xlu1 %324  ;;  %v368_v28 = vmul.f32 %v1807_v22, %v1807_v22 }
 0x193   :  { %v1394_v30 = vpop.eup %1393  ;;  %v353_v43 = vmul.f32 0.015625, %v325_v33  ;;  %v322_v46 = vpop.xlane.xlu0 %321  ;;  %1322 = vmatmul.mubr.msk.bf16.vlgmr.msra.gmra.mrb[0].mxu1 %vm214_vm1, %v513_v25 }
 0x194   :  { %v1396_v47 = vpop.eup %1395  ;;  %v352_v60 = vmul.f32 0.015625, %v322_v46  ;;  %v445_v4 = vmul.f32 %v1394_v30, %v397_v24 }
 0x195   :  { %v385_v49 = vsub.f32 %v353_v43, %v369_v41  ;;  %v444_v62 = vmul.f32 %v1396_v47, %v396_v34  ;;  %v401_v43 = vsub.f32 %v1642_v17, %v1804_v19 }
 0x196   :  { %v384_v31 = vsub.f32 %v352_v60, %v368_v28  ;;  %v331_v42 = vpop.xlane.xlu1 %330  ;;  %v465_v50 = vmul.f32 %v1771_v8, %v445_v4  ;;  %v400_v4 = vsub.f32 %v1645_v18, %v1807_v22  ;;  %v402_v22 = vsub.f32 %v1636_v14, %v1815_v39 }
 0x197   :  { %v1398_v51 = vpop.eup %1397  ;;  %v417_v36 = vadd.f32 1e-05, %v385_v49  ;;  %v355_v53 = vmul.f32 0.015625, %v331_v42  ;;  %v328_v55 = vpop.xlane.xlu0 %327  ;;  %v464_v52 = vmul.f32 %v1771_v8, %v444_v62  ;;  %v403_v42 = vsub.f32 %v1632_v12, %v1811_v32 }
 0x198   :  { %v1400_v10 = vpop.eup %1399  ;;  %v416_v56 = vadd.f32 1e-05, %v384_v31  ;;  %v354_v57 = vmul.f32 0.015625, %v328_v55  ;;  %v485_v54 = vadd.f32 %v1786_v38, %v465_v50  ;;  %v447_v16 = vmul.f32 %v1398_v51, %v399_v48 }
 0x199   :  { %1401 = vrsqrt.f32 %v417_v36  ;;  %v387_v58 = vsub.f32 %v355_v53, %v371_v29  ;;  %v484_v59 = vadd.f32 %v1786_v38, %v464_v52  ;;  %v446_v61 = vmul.f32 %v1400_v10, %v398_v6 }
 0x19a   :  { %1403 = vrsqrt.f32 %v416_v56  ;;  %v386_v63 = vsub.f32 %v354_v57, %v370_v35  ;;  %v262_v0 = vpop.xlane.xlu1 %261  ;;  %v501_v1 = vmax.f32 %v485_v54, 0.0  ;;  %v467_v3 = vmul.f32 %v1771_v8, %v447_v16 }
 0x19b   :  { %v419_v5 = vadd.f32 1e-05, %v387_v58  ;;  %v259_v9 = vpop.xlane.xlu0 %258  ;;  %v500_v11 = vmax.f32 %v484_v59, 0.0  ;;  %v466_v13 = vmul.f32 %v1771_v8, %v446_v61  ;;  %v1845_v46 = vmul.f32 0.015625, %v262_v0 }
 0x19c   :  { %v418_v15 = vadd.f32 1e-05, %v386_v63  ;;  %v487_v20 = vadd.f32 %v1786_v38, %v467_v3  ;;  %v1849_v48 = vmul.f32 0.015625, %v259_v9 }
 0x19d   :  { %1405 = vrsqrt.f32 %v419_v5  ;;  %v514_v21 = vpack.c.bf16 %v501_v1, %v500_v11  ;;  %v486_v24 = vadd.f32 %v1786_v38, %v466_v13  ;;  %v375_v51 = vmul.f32 %v1845_v46, %v1845_v46 }
 0x19e   :  { %1407 = vrsqrt.f32 %v418_v15  ;;  %v256_v23 = vpop.xlane.xlu1 %255  ;;  %v503_v30 = vmax.f32 %v487_v20, 0.0  ;;  %v374_v52 = vmul.f32 %v1849_v48, %v1849_v48 }
 0x19f   :  { %v1838_v33 = vmul.f32 0.015625, %v256_v23  ;;  %1325 = vmatprep.mubr.msk.bf16.mxu1 %vm214_vm1, %v514_v21  ;;  %v253_v25 = vpop.xlane.xlu0 %252  ;;  %v502_v41 = vmax.f32 %v486_v24, 0.0 }
 0x1a0   :  { %v1841_v34 = vmul.f32 0.015625, %v253_v25 }
 0x1a1   :  { %v515_v28 = vpack.c.bf16 %v503_v30, %v502_v41  ;;  %v373_v49 = vmul.f32 %v1838_v33, %v1838_v33  ;;  %v405_v25 = vsub.f32 %v1683_v44, %v1838_v33 }
 0x1a2   :  { %v337_v47 = vpop.xlane.xlu1 %336  ;;  %v372_v31 = vmul.f32 %v1841_v34, %v1841_v34  ;;  %v404_v41 = vsub.f32 %v1686_v45, %v1841_v34 }
 0x1a3   :  { %v1402_v60 = vpop.eup %1401  ;;  %v357_v62 = vmul.f32 0.015625, %v337_v47  ;;  %v334_v6 = vpop.xlane.xlu0 %333  ;;  %1326 = vmatmul.mubr.msk.bf16.gmra.mrb[4].mxu1 %vm214_vm1, %v515_v28 }
 0x1a4   :  { %v1404_v29 = vpop.eup %1403  ;;  %v356_v17 = vmul.f32 0.015625, %v334_v6  ;;  %v449_v19 = vmul.f32 %v1402_v60, %v401_v43  ;;  %v407_v60 = vsub.f32 %v1670_v37, %v1845_v46 }
 0x1a5   :  { %v389_v50 = vsub.f32 %v357_v62, %v373_v49  ;;  %v448_v18 = vmul.f32 %v1404_v29, %v400_v4  ;;  %v406_v62 = vsub.f32 %v1674_v40, %v1849_v48 }
 0x1a6   :  { %v388_v35 = vsub.f32 %v356_v17, %v372_v31  ;;  %v343_v36 = vpop.xlane.xlu1 %342  ;;  %v469_v53 = vmul.f32 %v1771_v8, %v449_v19 }
 0x1a7   :  { %v1406_v55 = vpop.eup %1405  ;;  %v421_v10 = vadd.f32 1e-05, %v389_v50  ;;  %v359_v56 = vmul.f32 0.015625, %v343_v36  ;;  %v340_v57 = vpop.xlane.xlu0 %339  ;;  %v468_v12 = vmul.f32 %v1771_v8, %v448_v18 }
 0x1a8   :  { %v1408_v32 = vpop.eup %1407  ;;  %v420_v54 = vadd.f32 1e-05, %v388_v35  ;;  %v358_v16 = vmul.f32 0.015625, %v340_v57  ;;  %v489_v14 = vadd.f32 %v1786_v38, %v469_v53  ;;  %v451_v39 = vmul.f32 %v1406_v55, %v403_v42  ;;  %v69_v35 = vld [vmem:[%s2270_s1 + $0x78] sm:$0xff]  ;;  %v1909_v53 = vld [vmem:[%s2271_s6] sm:$0x1f] }
 0x1a9   :  { %1409 = vrsqrt.f32 %v421_v10  ;;  %v391_v58 = vsub.f32 %v359_v56, %v375_v51  ;;  %v488_v59 = vadd.f32 %v1786_v38, %v468_v12  ;;  %v450_v61 = vmul.f32 %v1408_v32, %v402_v22  ;;  %v66_v22 = vld [vmem:[%s2270_s1 + $0x60] sm:$0xff] }
 0x1aa   :  { %1411 = vrsqrt.f32 %v420_v54  ;;  %v390_v63 = vsub.f32 %v358_v16, %v374_v52  ;;  %v505_v0 = vmax.f32 %v489_v14, 0.0  ;;  %v471_v1 = vmul.f32 %v1771_v8, %v451_v39 }
 0x1ab   :  { %v423_v3 = vadd.f32 1e-05, %v391_v58  ;;  %v504_v5 = vmax.f32 %v488_v59, 0.0  ;;  %v470_v9 = vmul.f32 %v1771_v8, %v450_v61  ;;  %v1914_v55 = vrot.slane %v1909_v53, %v84_v27 }
 0x1ac   :  { %v422_v11 = vadd.f32 1e-05, %v390_v63  ;;  %v491_v13 = vadd.f32 %v1786_v38, %v471_v1 }
 0x1ad   :  { %1413 = vrsqrt.f32 %v423_v3  ;;  %v516_v15 = vpack.c.bf16 %v505_v0, %v504_v5  ;;  %v490_v20 = vadd.f32 %v1786_v38, %v470_v9 }
 0x1ae   :  { %1415 = vrsqrt.f32 %v422_v11  ;;  %v507_v21 = vmax.f32 %v491_v13, 0.0 }
 0x1af   :  { %1329 = vmatprep.mubr.msk.bf16.mxu1 %vm214_vm1, %v516_v15  ;;  %v506_v23 = vmax.f32 %v490_v20, 0.0 }
 0x1b1   :  { %v517_v24 = vpack.c.bf16 %v507_v21, %v506_v23 }
 0x1b3   :  { %v1410_v30 = vpop.eup %1409  ;;  %1330 = vmatmul.mubr.msk.bf16.gmra.mrb[8].mxu1 %vm214_vm1, %v517_v24 }
 0x1b4   :  { %v1412_v43 = vpop.eup %1411  ;;  %v453_v47 = vmul.f32 %v1410_v30, %v405_v25 }
 0x1b5   :  { %v452_v28 = vmul.f32 %v1412_v43, %v404_v41 }
 0x1b6   :  { %v473_v4 = vmul.f32 %v1771_v8, %v453_v47 }
 0x1b7   :  { %v1414_v49 = vpop.eup %1413  ;;  %v472_v44 = vmul.f32 %v1771_v8, %v452_v28 }
 0x1b8   :  { %v1416_v33 = vpop.eup %1415  ;;  %v493_v6 = vadd.f32 %v1786_v38, %v473_v4  ;;  %v455_v45 = vmul.f32 %v1414_v49, %v407_v60 }
 0x1b9   :  { %v492_v34 = vadd.f32 %v1786_v38, %v472_v44  ;;  %v454_v29 = vmul.f32 %v1416_v33, %v406_v62 }
 0x1ba   :  { %v509_v31 = vmax.f32 %v493_v6, 0.0  ;;  %v475_v17 = vmul.f32 %v1771_v8, %v455_v45 }
 0x1bb   :  { %v508_v19 = vmax.f32 %v492_v34, 0.0  ;;  %v474_v37 = vmul.f32 %v1771_v8, %v454_v29  ;;  %v67_v8 = vld [vmem:[%s2270_s1 + $0x68] sm:$0xff] }
 0x1bc   :  { %v495_v46 = vadd.f32 %v1786_v38, %v475_v17  ;;  %v76_v51 = vpack.c.bf16 %v67_v8, %v66_v22 }
 0x1bd   :  { %v518_v42 = vpack.c.bf16 %v509_v31, %v508_v19  ;;  %v494_v40 = vadd.f32 %v1786_v38, %v474_v37  ;;  %v68_v38 = vld [vmem:[%s2270_s1 + $0x70] sm:$0xff] }
 0x1be   :  { %v511_v48 = vmax.f32 %v495_v46, 0.0  ;;  %v77_v36 = vpack.c.bf16 %v69_v35, %v68_v38  ;;  %1351 = vmatprep.mubr.msk.bf16.mxu0 %vm964_vm3, %v76_v51 }
 0x1bf   :  { %1333 = vmatprep.mubr.msk.bf16.mxu1 %vm214_vm1, %v518_v42  ;;  %v510_v50 = vmax.f32 %v494_v40, 0.0 }
 0x1c0   :  { %1352 = vmatmul.mubr.msk.bf16.gmra.mrb[28].mxu0 %vm964_vm3, %v77_v36 }
 0x1c1   :  { %v519_v18 = vpack.c.bf16 %v511_v48, %v510_v50 }
 0x1c3   :  { %1334 = vmatmul.mubr.msk.bf16.gmra.mrb[12].mxu1 %vm214_vm1, %v519_v18 }
 0x1c8   :  { %v1994_v48 = vpop.f32.mrb[16].mxu0 }
 0x1c9   :  { %v1996_v50 = vpop.f32.mrb[17].mxu0 }
 0x1ca   :  { %v2002_v8 = vpop.f32.mrb[18].mxu0 }
 0x1cb   :  { %v2004_v51 = vpop.f32.mrb[19].mxu0 }
 0x266   :  { %v1323_v52 = vpop.f32.mrb[0].mxu1 }
 0x267   :  { %v614_v10 = vpop.f32.mrb[1].mxu1  ;;  %v1931_v39 = vadd.f32 %v1323_v52, %v1914_v55 }
 0x268   :  { %v1917_v56 = vadd.f32 %v614_v10, %v1914_v55  ;;  %v1324_v57 = vpop.f32.mrb[2].mxu1 }
 0x269   :  { %v617_v12 = vpop.f32.mrb[3].mxu1  ;;  %v1935_v59 = vadd.f32 %v1324_v57, %v1914_v55  ;;  %v684_v63 = vsel %vm677_vm4, %v1931_v39, 0.0  ;;  %v745_v0 = vmul.f32 %v1931_v39, %v1931_v39 }
 0x26a   :  { %v1920_v32 = vadd.f32 %v617_v12, %v1914_v55  ;;  %v678_v54 = vsel %vm677_vm4, %v1917_v56, 0.0  ;;  %v743_v16 = vmul.f32 %v1917_v56, %v1917_v56 }
 0x26b   :  { %679 = vadd.xlane.f32.xlu0 %v678_v54  ;;  %v687_v1 = vsel %vm677_vm4, %v1935_v59, 0.0  ;;  %v746_v3 = vmul.f32 %v1935_v59, %v1935_v59  ;;  %v765_v9 = vsel %vm677_vm4, %v745_v0, 0.0 }
 0x26c   :  { %v681_v27 = vsel %vm677_vm4, %v1920_v32, 0.0  ;;  %v744_v14 = vmul.f32 %v1920_v32, %v1920_v32  ;;  %v759_v58 = vsel %vm677_vm4, %v743_v16, 0.0 }
 0x26d   :  { %682 = vadd.xlane.f32.xlu1 %v681_v27  ;;  %v768_v20 = vsel %vm677_vm4, %v746_v3, 0.0 }
 0x26e   :  { %v762_v61 = vsel %vm677_vm4, %v744_v14, 0.0 }
 0x26f   :  { %760 = vadd.xlane.f32.xlu0 %v759_v58 }
 0x271   :  { %763 = vadd.xlane.f32.xlu1 %v762_v61 }
 0x273   :  { %685 = vadd.xlane.f32.xlu0 %v684_v63 }
 0x275   :  { %688 = vadd.xlane.f32.xlu1 %v687_v1 }
 0x276   :  { %v1327_v5 = vpop.f32.mrb[4].mxu1 }
 0x277   :  { %766 = vadd.xlane.f32.xlu0 %v765_v9  ;;  %v630_v11 = vpop.f32.mrb[5].mxu1  ;;  %v1963_v43 = vadd.f32 %v1327_v5, %v1914_v55  ;;  %v2034_v9 = vpop.f32.mrb[20].mxu0 }
 0x278   :  { %v1948_v13 = vadd.f32 %v630_v11, %v1914_v55  ;;  %v1328_v15 = vpop.f32.mrb[6].mxu1 }
 0x279   :  { %769 = vadd.xlane.f32.xlu1 %v768_v20  ;;  %v633_v21 = vpop.f32.mrb[7].mxu1  ;;  %v1967_v28 = vadd.f32 %v1328_v15, %v1914_v55  ;;  %v696_v4 = vsel %vm677_vm4, %v1963_v43, 0.0  ;;  %v749_v49 = vmul.f32 %v1963_v43, %v1963_v43  ;;  %v2040_v20 = vpop.f32.mrb[21].mxu0 }
 0x27a   :  { %v1952_v23 = vadd.f32 %v633_v21, %v1914_v55  ;;  %v690_v24 = vsel %vm677_vm4, %v1948_v13, 0.0  ;;  %v747_v25 = vmul.f32 %v1948_v13, %v1948_v13  ;;  %v1449_v21 = vmov 0.0  }
 0x27b   :  { %691 = vadd.xlane.f32.xlu0 %v690_v24  ;;  %v699_v62 = vsel %vm677_vm4, %v1967_v28, 0.0  ;;  %v750_v44 = vmul.f32 %v1967_v28, %v1967_v28  ;;  %v777_v6 = vsel %vm677_vm4, %v749_v49, 0.0  ;;  %1355 = vmatprep.subr.bf16.mxu1 %v1449_v21  ;;  %v2043_v24 = vpop.f32.mrb[22].mxu0 }
 0x27c   :  { %v693_v30 = vsel %vm677_vm4, %v1952_v23, 0.0  ;;  %v748_v41 = vmul.f32 %v1952_v23, %v1952_v23  ;;  %v771_v47 = vsel %vm677_vm4, %v747_v25, 0.0  ;;  %1371 = vmatprep.mubr.msk.bf16.mxu1 %vm1450_vm5, %v1449_v21 }
 0x27d   :  { %694 = vadd.xlane.f32.xlu1 %v693_v30  ;;  %v780_v31 = vsel %vm677_vm4, %v750_v44, 0.0 }
 0x27e   :  { %v774_v60 = vsel %vm677_vm4, %v748_v41, 0.0  ;;  %v2049_v41 = vpop.f32.mrb[23].mxu0 }
 0x27f   :  { %772 = vadd.xlane.f32.xlu0 %v771_v47  ;;  %v2061_v44 = vpop.f32.mrb[24].mxu0 }
 0x281   :  { %775 = vadd.xlane.f32.xlu1 %v774_v60 }
 0x283   :  { %697 = vadd.xlane.f32.xlu0 %v696_v4 }
 0x285   :  { %700 = vadd.xlane.f32.xlu1 %v699_v62 }
 0x286   :  { %v1331_v33 = vpop.f32.mrb[8].mxu1 }
 0x287   :  { %v646_v45 = vpop.f32.mrb[9].mxu1  ;;  %778 = vadd.xlane.f32.xlu0 %v777_v6  ;;  %v1999_v18 = vadd.f32 %v1331_v33, %v1914_v55  ;;  %v2063_v33 = vpop.f32.mrb[25].mxu0 }
 0x288   :  { %v1980_v34 = vadd.f32 %v646_v45, %v1914_v55  ;;  %v1332_v29 = vpop.f32.mrb[10].mxu1  ;;  %v2065_v6 = vpop.f32.mrb[26].mxu0 }
 0x289   :  { %v649_v17 = vpop.f32.mrb[11].mxu1  ;;  %781 = vadd.xlane.f32.xlu1 %v780_v31  ;;  %v2007_v38 = vadd.f32 %v1332_v29, %v1914_v55  ;;  %v708_v36 = vsel %vm677_vm4, %v1999_v18, 0.0  ;;  %v753_v52 = vmul.f32 %v1999_v18, %v1999_v18  ;;  %v2067_v45 = vpop.f32.mrb[27].mxu0 }
 0x28a   :  { %v1984_v19 = vadd.f32 %v649_v17, %v1914_v55  ;;  %v702_v37 = vsel %vm677_vm4, %v1980_v34, 0.0  ;;  %v751_v46 = vmul.f32 %v1980_v34, %v1980_v34 }
 0x28b   :  { %703 = vadd.xlane.f32.xlu0 %v702_v37  ;;  %v711_v10 = vsel %vm677_vm4, %v2007_v38, 0.0  ;;  %v754_v57 = vmul.f32 %v2007_v38, %v2007_v38  ;;  %v789_v54 = vsel %vm677_vm4, %v753_v52, 0.0 }
 0x28c   :  { %v705_v42 = vsel %vm677_vm4, %v1984_v19, 0.0  ;;  %v752_v40 = vmul.f32 %v1984_v19, %v1984_v19  ;;  %v783_v22 = vsel %vm677_vm4, %v751_v46, 0.0  ;;  %v1451_v46 = vmov 0  }
 0x28d   :  { %706 = vadd.xlane.f32.xlu1 %v705_v42  ;;  %v792_v58 = vsel %vm677_vm4, %v754_v57, 0.0  ;;  %1379 = vset.pattern.permute.xlu0 %v1451_v46 }
 0x28e   :  { %v786_v35 = vsel %vm677_vm4, %v752_v40, 0.0 }
 0x28f   :  { %784 = vadd.xlane.f32.xlu0 %v783_v22 }
 0x291   :  { %787 = vadd.xlane.f32.xlu1 %v786_v35 }
 0x293   :  { %709 = vadd.xlane.f32.xlu0 %v708_v36  ;;  %v2069_v29 = vpop.f32.mrb[28].mxu0 }
 0x294   :  { %v2071_v31 = vpop.f32.mrb[29].mxu0 }
 0x295   :  { %712 = vadd.xlane.f32.xlu1 %v711_v10  ;;  %v2073_v17 = vpop.f32.mrb[30].mxu0 }
 0x296   :  { %v1335_v12 = vpop.f32.mrb[12].mxu1  ;;  %v2075_v37 = vpop.f32.mrb[31].mxu0 }
 0x297   :  { %v662_v16 = vpop.f32.mrb[13].mxu1  ;;  %790 = vadd.xlane.f32.xlu0 %v789_v54  ;;  %v2037_v11 = vadd.f32 %v1335_v12, %v1914_v55 }
 0x298   :  { %v2020_v27 = vadd.f32 %v662_v16, %v1914_v55  ;;  %v1336_v14 = vpop.f32.mrb[14].mxu1 }
 0x299   :  { %v665_v61 = vpop.f32.mrb[15].mxu1  ;;  %793 = vadd.xlane.f32.xlu1 %v792_v58  ;;  %v2046_v25 = vadd.f32 %v1336_v14, %v1914_v55  ;;  %v720_v47 = vsel %vm677_vm4, %v2037_v11, 0.0  ;;  %v757_v60 = vmul.f32 %v2037_v11, %v2037_v11 }
 0x29a   :  { %v2024_v63 = vadd.f32 %v665_v61, %v1914_v55  ;;  %v714_v0 = vsel %vm677_vm4, %v2020_v27, 0.0  ;;  %v755_v1 = vmul.f32 %v2020_v27, %v2020_v27 }
 0x29b   :  { %715 = vadd.xlane.f32.xlu0 %v714_v0  ;;  %v723_v4 = vsel %vm677_vm4, %v2046_v25, 0.0  ;;  %v758_v49 = vmul.f32 %v2046_v25, %v2046_v25  ;;  %v801_v55 = vsel %vm677_vm4, %v757_v60, 0.0 }
 0x29c   :  { %v717_v3 = vsel %vm677_vm4, %v2024_v63, 0.0  ;;  %v756_v5 = vmul.f32 %v2024_v63, %v2024_v63  ;;  %v795_v15 = vsel %vm677_vm4, %v755_v1, 0.0 }
 0x29d   :  { %718 = vadd.xlane.f32.xlu1 %v717_v3  ;;  %v804_v62 = vsel %vm677_vm4, %v758_v49, 0.0 }
 0x29e   :  { %v798_v30 = vsel %vm677_vm4, %v756_v5, 0.0 }
 0x29f   :  { %796 = vadd.xlane.f32.xlu0 %v795_v15 }
 0x2a1   :  { %799 = vadd.xlane.f32.xlu1 %v798_v30  ;;  %v962_v30 = vsub.s32 3, %v1556_v26 }
 0x2a3   :  { %721 = vadd.xlane.f32.xlu0 %v720_v47 }
 0x2a5   :  { %724 = vadd.xlane.f32.xlu1 %v723_v4 }
 0x2a7   :  { %802 = vadd.xlane.f32.xlu0 %v801_v55 }
 0x2a9   :  { %805 = vadd.xlane.f32.xlu1 %v804_v62 }
 0x2bd   :  { %1216 = vperm.xlu0 %1379, %v1909_v53  }
 0x2f8   :  { %v680_v42 = vpop.xlane.xlu0 %679 }
 0x2f9   :  { %v727_v40 = vmul.f32 0.03125, %v680_v42  ;;  %v2089_v42 = vrot.slane %v1909_v53, %v962_v30 }
 0x2fa   :  { %v683_v22 = vpop.xlane.xlu1 %682 }
 0x2fb   :  { %v728_v35 = vmul.f32 0.03125, %v683_v22  ;;  %v823_v52 = vmul.f32 %v727_v40, %v727_v40 }
 0x2fc   :  { %v761_v36 = vpop.xlane.xlu0 %760 }
 0x2fd   :  { %v807_v10 = vmul.f32 0.03125, %v761_v36  ;;  %v824_v12 = vmul.f32 %v728_v35, %v728_v35 }
 0x2fe   :  { %v764_v57 = vpop.xlane.xlu1 %763 }
 0x2ff   :  { %v839_v54 = vsub.f32 %v807_v10, %v823_v52  ;;  %v808_v16 = vmul.f32 0.03125, %v764_v57 }
 0x300   :  { %v686_v14 = vpop.xlane.xlu0 %685 }
 0x301   :  { %v871_v58 = vadd.f32 1e-05, %v839_v54  ;;  %v840_v61 = vsub.f32 %v808_v16, %v824_v12  ;;  %v2079_v0 = vmul.f32 0.03125, %v686_v14  ;;  %v855_v12 = vsub.f32 %v1917_v56, %v727_v40 }
 0x302   :  { %v689_v1 = vpop.xlane.xlu1 %688  ;;  %v2099_v16 = vrot.slane %v1909_v53, %v458_v2  ;;  %v1028_v14 = vadd.f32 %v1996_v50, %v2089_v42  ;;  %v2109_v56 = vrot.slane %v1909_v53, %v478_v7 }
 0x303   :  { %1417 = vrsqrt.f32 %v871_v58  ;;  %v872_v3 = vadd.f32 1e-05, %v840_v61  ;;  %v2081_v5 = vmul.f32 0.03125, %v689_v1  ;;  %v825_v47 = vmul.f32 %v2079_v0, %v2079_v0 }
 0x304   :  { %v767_v15 = vpop.xlane.xlu0 %766 }
 0x305   :  { %1419 = vrsqrt.f32 %v872_v3  ;;  %v809_v60 = vmul.f32 0.03125, %v767_v15  ;;  %v826_v49 = vmul.f32 %v2081_v5, %v2081_v5  ;;  %v856_v15 = vsub.f32 %v1920_v32, %v728_v35 }
 0x306   :  { %v770_v4 = vpop.xlane.xlu1 %769 }
 0x307   :  { %v841_v55 = vsub.f32 %v809_v60, %v825_v47  ;;  %v810_v62 = vmul.f32 0.03125, %v770_v4  ;;  %v1031_v60 = vadd.f32 %v2004_v51, %v2089_v42  ;;  %v857_v51 = vsub.f32 %v1931_v39, %v2079_v0 }
 0x308   :  { %v692_v46 = vpop.xlane.xlu0 %691 }
 0x309   :  { %v873_v22 = vadd.f32 1e-05, %v841_v55  ;;  %v842_v36 = vsub.f32 %v810_v62, %v826_v49  ;;  %v2091_v52 = vmul.f32 0.03125, %v692_v46  ;;  %v1090_v55 = vmax.f32 %v1028_v14, 0.0 }
 0x30a   :  { %v695_v10 = vpop.xlane.xlu1 %694 }
 0x30b   :  { %1421 = vrsqrt.f32 %v873_v22  ;;  %v874_v57 = vadd.f32 1e-05, %v842_v36  ;;  %v2094_v54 = vmul.f32 0.03125, %v695_v10  ;;  %v827_v1 = vmul.f32 %v2091_v52, %v2091_v52 }
 0x30c   :  { %v773_v58 = vpop.xlane.xlu0 %772  ;;  %v1091_v36 = vmax.f32 %v1031_v60, 0.0 }
 0x30d   :  { %v1418_v61 = vpop.eup %1417  ;;  %1423 = vrsqrt.f32 %v874_v57  ;;  %v811_v3 = vmul.f32 0.03125, %v773_v58  ;;  %v828_v50 = vmul.f32 %v2094_v54, %v2094_v54 }
 0x30e   :  { %v903_v40 = vmul.f32 %v1418_v61, %v855_v12  ;;  %v776_v2 = vpop.xlane.xlu1 %775 }
 0x30f   :  { %v1420_v30 = vpop.eup %1419  ;;  %v843_v47 = vsub.f32 %v811_v3, %v827_v1  ;;  %v812_v4 = vmul.f32 0.03125, %v776_v2  ;;  %v1036_v2 = vadd.f32 %v1994_v48, %v2089_v42 }
 0x310   :  { %v923_v49 = vmul.f32 %v2099_v16, %v903_v40  ;;  %v904_v32 = vmul.f32 %v1420_v30, %v856_v15  ;;  %v698_v35 = vpop.xlane.xlu0 %697  ;;  %v858_v15 = vsub.f32 %v1935_v59, %v2081_v5 }
 0x311   :  { %v875_v26 = vadd.f32 1e-05, %v843_v47  ;;  %v844_v62 = vsub.f32 %v812_v4, %v828_v50  ;;  %v2116_v7 = vmul.f32 0.03125, %v698_v35  ;;  %v1039_v50 = vadd.f32 %v2002_v8, %v2089_v42 }
 0x312   :  { %v943_v53 = vadd.f32 %v2109_v56, %v923_v49  ;;  %v924_v46 = vmul.f32 %v2099_v16, %v904_v32  ;;  %v701_v22 = vpop.xlane.xlu1 %700 }
 0x313   :  { %1425 = vrsqrt.f32 %v875_v26  ;;  %v876_v10 = vadd.f32 1e-05, %v844_v62  ;;  %v2123_v14 = vmul.f32 0.03125, %v701_v22  ;;  %v829_v1 = vmul.f32 %v2116_v7, %v2116_v7 }
 0x314   :  { %v1106_v57 = vadd.f32 %v1090_v55, %v943_v53  ;;  %v944_v12 = vadd.f32 %v2109_v56, %v924_v46  ;;  %v779_v58 = vpop.xlane.xlu0 %778  ;;  %v1092_v53 = vmax.f32 %v1036_v2, 0.0 }
 0x315   :  { %v1422_v61 = vpop.eup %1421  ;;  %1427 = vrsqrt.f32 %v876_v10  ;;  %v813_v3 = vmul.f32 0.03125, %v779_v58  ;;  %v830_v47 = vmul.f32 %v2123_v14, %v2123_v14 }
 0x316   :  { %v905_v40 = vmul.f32 %v1422_v61, %v857_v51  ;;  %v1107_v39 = vadd.f32 %v1091_v36, %v944_v12  ;;  %v782_v0 = vpop.xlane.xlu1 %781  ;;  %v1122_v55 = vmax.f32 %v1106_v57, 0.0  ;;  %v1093_v36 = vmax.f32 %v1039_v50, 0.0 }
 0x317   :  { %v1424_v30 = vpop.eup %1423  ;;  %v845_v60 = vsub.f32 %v813_v3, %v829_v1  ;;  %v814_v4 = vmul.f32 0.03125, %v782_v0  ;;  %v1044_v51 = vadd.f32 %v2040_v20, %v2089_v42  ;;  %v860_v20 = vsub.f32 %v1952_v23, %v2094_v54 }
 0x318   :  { %v925_v49 = vmul.f32 %v2099_v16, %v905_v40  ;;  %v906_v32 = vmul.f32 %v1424_v30, %v858_v15  ;;  %v1123_v59 = vmax.f32 %v1107_v39, 0.0  ;;  %v704_v5 = vpop.xlane.xlu0 %703  ;;  %v859_v15 = vsub.f32 %v1948_v13, %v2091_v52 }
 0x319   :  { %v877_v35 = vadd.f32 1e-05, %v845_v60  ;;  %v846_v26 = vsub.f32 %v814_v4, %v830_v47  ;;  %v2136_v48 = vmul.f32 0.03125, %v704_v5  ;;  %v1047_v0 = vadd.f32 %v2049_v41, %v2089_v42 }
 0x31a   :  { %v945_v62 = vadd.f32 %v2109_v56, %v925_v49  ;;  %v926_v8 = vmul.f32 %v2099_v16, %v906_v32  ;;  %v707_v46 = vpop.xlane.xlu1 %706  ;;  %v1139_v22 = vpack.c.bf16 %v1123_v59, %v1122_v55  ;;  %v1094_v55 = vmax.f32 %v1044_v51, 0.0 }
 0x31b   :  { %1429 = vrsqrt.f32 %v877_v35  ;;  %v878_v10 = vadd.f32 1e-05, %v846_v26  ;;  %v2143_v58 = vmul.f32 0.03125, %v707_v46  ;;  %v831_v40 = vmul.f32 %v2136_v48, %v2136_v48 }
 0x31c   :  { %v1108_v57 = vadd.f32 %v1092_v53, %v945_v62  ;;  %v946_v12 = vadd.f32 %v2109_v56, %v926_v8  ;;  %v785_v61 = vpop.xlane.xlu0 %784  ;;  %v1151_v1 = vsel %vm677_vm4, %v1139_v22, 0  ;;  %v1095_v8 = vmax.f32 %v1047_v0, 0.0 }
 0x31d   :  { %v1426_v3 = vpop.eup %1425  ;;  %1431 = vrsqrt.f32 %v878_v10  ;;  %v815_v2 = vmul.f32 0.03125, %v785_v61  ;;  %1356 = vmatpush3.bf16.xpose.msra.mxu1 %v1151_v1  ;;  %v832_v13 = vmul.f32 %v2143_v58, %v2143_v58  ;;  %v861_v22 = vsub.f32 %v1963_v43, %v2116_v7 }
 0x31e   :  { %v1109_v39 = vadd.f32 %v1093_v36, %v946_v12  ;;  %v788_v30 = vpop.xlane.xlu1 %787  ;;  %1357 = vmatprep.subr.bf16.mxu1 %v1449_v21  ;;  %v907_v52 = vmul.f32 %v1426_v3, %v859_v15  ;;  %v1124_v4 = vmax.f32 %v1108_v57, 0.0  ;;  %v862_v15 = vsub.f32 %v1967_v28, %v2123_v14 }
 0x31f   :  { %v1428_v50 = vpop.eup %1427  ;;  %v847_v47 = vsub.f32 %v815_v2, %v831_v40  ;;  %v816_v60 = vmul.f32 0.03125, %v788_v30  ;;  %v1052_v43 = vadd.f32 %v2034_v9, %v2089_v42 }
 0x320   :  { %v1125_v49 = vmax.f32 %v1109_v39, 0.0  ;;  %v908_v32 = vmul.f32 %v1428_v50, %v860_v20  ;;  %v710_v59 = vpop.xlane.xlu0 %709  ;;  %v927_v23 = vmul.f32 %v2099_v16, %v907_v52  ;;  %v1055_v39 = vadd.f32 %v2043_v24, %v2089_v42 }
 0x321   :  { %v879_v54 = vadd.f32 1e-05, %v847_v47  ;;  %v848_v5 = vsub.f32 %v816_v60, %v832_v13  ;;  %v2158_v41 = vmul.f32 0.03125, %v710_v59 }
 0x322   :  { %v928_v35 = vmul.f32 %v2099_v16, %v908_v32  ;;  %v713_v26 = vpop.xlane.xlu1 %712  ;;  %v1140_v62 = vpack.c.bf16 %v1125_v49, %v1124_v4  ;;  %v947_v53 = vadd.f32 %v2109_v56, %v927_v23  ;;  %v1097_v23 = vmax.f32 %v1055_v39, 0.0 }
 0x323   :  { %1433 = vrsqrt.f32 %v879_v54  ;;  %v880_v46 = vadd.f32 1e-05, %v848_v5  ;;  %v2165_v10 = vmul.f32 0.03125, %v713_v26  ;;  %v833_v1 = vmul.f32 %v2158_v41, %v2158_v41 }
 0x324   :  { %v948_v36 = vadd.f32 %v2109_v56, %v928_v35  ;;  %v791_v51 = vpop.xlane.xlu0 %790  ;;  %v1154_v57 = vsel %vm677_vm4, %v1140_v62, 0  ;;  %v1110_v61 = vadd.f32 %v1094_v55, %v947_v53  ;;  %v1096_v55 = vmax.f32 %v1052_v43, 0.0 }
 0x325   :  { %v1430_v12 = vpop.eup %1429  ;;  %1435 = vrsqrt.f32 %v880_v46  ;;  %v817_v3 = vmul.f32 0.03125, %v791_v51  ;;  %1358 = vmatpush3.bf16.xpose.msra.mxu1 %v1154_v57  ;;  %v834_v0 = vmul.f32 %v2165_v10, %v2165_v10  ;;  %v1060_v5 = vadd.f32 %v2063_v33, %v2089_v42 }
 0x326   :  { %v909_v40 = vmul.f32 %v1430_v12, %v861_v22  ;;  %v1111_v7 = vadd.f32 %v1095_v8, %v948_v36  ;;  %v794_v2 = vpop.xlane.xlu1 %793  ;;  %1359 = vmatprep.subr.bf16.mxu1 %v1449_v21  ;;  %v1126_v28 = vmax.f32 %v1110_v61, 0.0  ;;  %v863_v22 = vsub.f32 %v1980_v34, %v2136_v48 }
 0x327   :  { %v1432_v20 = vpop.eup %1431  ;;  %v849_v30 = vsub.f32 %v817_v3, %v833_v1  ;;  %v818_v50 = vmul.f32 0.03125, %v794_v2  ;;  %v864_v33 = vsub.f32 %v1984_v19, %v2143_v58  ;;  %v1063_v12 = vadd.f32 %v2067_v45, %v2089_v42 }
 0x328   :  { %v929_v13 = vmul.f32 %v2099_v16, %v909_v40  ;;  %v910_v14 = vmul.f32 %v1432_v20, %v862_v15  ;;  %v1127_v52 = vmax.f32 %v1111_v7, 0.0  ;;  %v716_v47 = vpop.xlane.xlu0 %715  ;;  %v1098_v7 = vmax.f32 %v1060_v5, 0.0 }
 0x329   :  { %v881_v9 = vadd.f32 1e-05, %v849_v30  ;;  %v850_v60 = vsub.f32 %v818_v50, %v834_v0  ;;  %v2180_v4 = vmul.f32 0.03125, %v716_v47 }
 0x32a   :  { %v949_v49 = vadd.f32 %v2109_v56, %v929_v13  ;;  %v930_v24 = vmul.f32 %v2099_v16, %v910_v14  ;;  %v719_v32 = vpop.xlane.xlu1 %718  ;;  %v1141_v59 = vpack.c.bf16 %v1127_v52, %v1126_v28  ;;  %v1099_v28 = vmax.f32 %v1063_v12, 0.0 }
 0x32b   :  { %1437 = vrsqrt.f32 %v881_v9  ;;  %v882_v54 = vadd.f32 1e-05, %v850_v60  ;;  %v2187_v62 = vmul.f32 0.03125, %v719_v32  ;;  %v835_v36 = vmul.f32 %v2180_v4, %v2180_v4 }
 0x32c   :  { %v1112_v35 = vadd.f32 %v1096_v55, %v949_v49  ;;  %v950_v26 = vadd.f32 %v2109_v56, %v930_v24  ;;  %v797_v53 = vpop.xlane.xlu0 %796  ;;  %v1157_v8 = vsel %vm677_vm4, %v1141_v59, 0  ;;  %v865_v52 = vsub.f32 %v1999_v18, %v2158_v41 }
 0x32d   :  { %v1434_v46 = vpop.eup %1433  ;;  %1439 = vrsqrt.f32 %v882_v54  ;;  %v819_v51 = vmul.f32 0.03125, %v797_v53  ;;  %1360 = vmatpush3.bf16.xpose.msra.mxu1 %v1157_v8  ;;  %v836_v34 = vmul.f32 %v2187_v62, %v2187_v62  ;;  %v1068_v18 = vadd.f32 %v2061_v44, %v2089_v42 }
 0x32e   :  { %v1113_v57 = vadd.f32 %v1097_v23, %v950_v26  ;;  %v800_v61 = vpop.xlane.xlu1 %799  ;;  %1361 = vmatprep.subr.bf16.mxu1 %v1449_v21  ;;  %v911_v48 = vmul.f32 %v1434_v46, %v863_v22  ;;  %v1128_v40 = vmax.f32 %v1112_v35, 0.0  ;;  %v866_v23 = vsub.f32 %v2007_v38, %v2165_v10 }
 0x32f   :  { %v1436_v1 = vpop.eup %1435  ;;  %v851_v3 = vsub.f32 %v819_v51, %v835_v36  ;;  %v820_v15 = vmul.f32 0.03125, %v800_v61  ;;  %v1071_v26 = vadd.f32 %v2065_v6, %v2089_v42 }
 0x330   :  { %v1129_v43 = vmax.f32 %v1113_v57, 0.0  ;;  %v912_v2 = vmul.f32 %v1436_v1, %v864_v33  ;;  %v722_v20 = vpop.xlane.xlu0 %721  ;;  %v931_v19 = vmul.f32 %v2099_v16, %v911_v48  ;;  %v1100_v57 = vmax.f32 %v1068_v18, 0.0 }
 0x331   :  { %v883_v58 = vadd.f32 1e-05, %v851_v3  ;;  %v852_v39 = vsub.f32 %v820_v15, %v836_v34  ;;  %v2202_v45 = vmul.f32 0.03125, %v722_v20  ;;  %v1101_v1 = vmax.f32 %v1071_v26, 0.0 }
 0x332   :  { %v932_v0 = vmul.f32 %v2099_v16, %v912_v2  ;;  %v725_v30 = vpop.xlane.xlu1 %724  ;;  %v1142_v50 = vpack.c.bf16 %v1129_v43, %v1128_v40  ;;  %v951_v13 = vadd.f32 %v2109_v56, %v931_v19  ;;  %v1076_v34 = vadd.f32 %v2071_v31, %v2089_v42 }
 0x333   :  { %1441 = vrsqrt.f32 %v883_v58  ;;  %v884_v14 = vadd.f32 1e-05, %v852_v39  ;;  %v2209_v9 = vmul.f32 0.03125, %v725_v30  ;;  %v837_v32 = vmul.f32 %v2202_v45, %v2202_v45 }
 0x334   :  { %v952_v47 = vadd.f32 %v2109_v56, %v932_v0  ;;  %v803_v60 = vpop.xlane.xlu0 %802  ;;  %v1160_v49 = vsel %vm677_vm4, %v1142_v50, 0  ;;  %v1114_v24 = vadd.f32 %v1098_v7, %v951_v13  ;;  %v867_v48 = vsub.f32 %v2020_v27, %v2180_v4 }
 0x335   :  { %v1438_v55 = vpop.eup %1437  ;;  %1443 = vrsqrt.f32 %v884_v14  ;;  %v821_v59 = vmul.f32 0.03125, %v803_v60  ;;  %1362 = vmatpush3.bf16.xpose.msra.mxu1 %v1160_v49  ;;  %v838_v53 = vmul.f32 %v2209_v9, %v2209_v9  ;;  %v868_v7 = vsub.f32 %v2024_v63, %v2187_v62 }
 0x336   :  { %v913_v54 = vmul.f32 %v1438_v55, %v865_v52  ;;  %v1115_v41 = vadd.f32 %v1099_v28, %v952_v47  ;;  %v806_v5 = vpop.xlane.xlu1 %805  ;;  %1363 = vmatprep.subr.bf16.mxu1 %v1449_v21  ;;  %v1130_v38 = vmax.f32 %v1114_v24, 0.0  ;;  %v1102_v31 = vmax.f32 %v1076_v34, 0.0 }
 0x337   :  { %v1440_v35 = vpop.eup %1439  ;;  %v853_v8 = vsub.f32 %v821_v59, %v837_v32  ;;  %v822_v46 = vmul.f32 0.03125, %v806_v5  ;;  %v1079_v27 = vadd.f32 %v2075_v37, %v2089_v42  ;;  %v869_v62 = vsub.f32 %v2037_v11, %v2202_v45 }
 0x338   :  { %v933_v22 = vmul.f32 %v2099_v16, %v913_v54  ;;  %v914_v10 = vmul.f32 %v1440_v35, %v866_v23  ;;  %v1131_v36 = vmax.f32 %v1115_v41, 0.0  ;;  %v870_v47 = vsub.f32 %v2046_v25, %v2209_v9 }
 0x339   :  { %v885_v51 = vadd.f32 1e-05, %v853_v8  ;;  %v854_v44 = vsub.f32 %v822_v46, %v838_v53  ;;  %v1103_v63 = vmax.f32 %v1079_v27, 0.0  ;;  %v1084_v49 = vadd.f32 %v2069_v29, %v2089_v42 }
 0x33a   :  { %v953_v33 = vadd.f32 %v2109_v56, %v933_v22  ;;  %v934_v12 = vmul.f32 %v2099_v16, %v914_v10  ;;  %v1143_v61 = vpack.c.bf16 %v1131_v36, %v1130_v38  ;;  %v1087_v11 = vadd.f32 %v2073_v17, %v2089_v42 }
 0x33b   :  { %1445 = vrsqrt.f32 %v885_v51  ;;  %v886_v6 = vadd.f32 1e-05, %v854_v44  ;;  %v1104_v18 = vmax.f32 %v1084_v49, 0.0 }
 0x33c   :  { %v1116_v3 = vadd.f32 %v1100_v57, %v953_v33  ;;  %v954_v15 = vadd.f32 %v2109_v56, %v934_v12  ;;  %v1163_v40 = vsel %vm677_vm4, %v1143_v61, 0  ;;  %v1105_v5 = vmax.f32 %v1087_v11, 0.0 }
 0x33d   :  { %v1442_v43 = vpop.eup %1441  ;;  %1447 = vrsqrt.f32 %v886_v6  ;;  %1364 = vmatpush3.bf16.xpose.msra.mxu1 %v1163_v40 }
 0x33e   :  { %v1117_v2 = vadd.f32 %v1101_v1, %v954_v15  ;;  %v915_v20 = vmul.f32 %v1442_v43, %v867_v48  ;;  %1365 = vmatprep.subr.bf16.mxu1 %v1449_v21  ;;  %v1132_v4 = vmax.f32 %v1116_v3, 0.0 }
 0x33f   :  { %v1444_v19 = vpop.eup %1443 }
 0x340   :  { %v1133_v58 = vmax.f32 %v1117_v2, 0.0  ;;  %v935_v39 = vmul.f32 %v2099_v16, %v915_v20  ;;  %v916_v0 = vmul.f32 %v1444_v19, %v868_v7 }
 0x342   :  { %v955_v30 = vadd.f32 %v2109_v56, %v935_v39  ;;  %v936_v50 = vmul.f32 %v2099_v16, %v916_v0  ;;  %v1144_v13 = vpack.c.bf16 %v1133_v58, %v1132_v4 }
 0x344   :  { %v1118_v28 = vadd.f32 %v1102_v31, %v955_v30  ;;  %v956_v14 = vadd.f32 %v2109_v56, %v936_v50  ;;  %v1166_v52 = vsel %vm677_vm4, %v1144_v13, 0 }
 0x345   :  { %v1446_v37 = vpop.eup %1445  ;;  %1366 = vmatpush3.bf16.xpose.msra.mxu1 %v1166_v52 }
 0x346   :  { %v917_v60 = vmul.f32 %v1446_v37, %v869_v62  ;;  %v1119_v55 = vadd.f32 %v1103_v63, %v956_v14  ;;  %1367 = vmatprep.subr.bf16.mxu1 %v1449_v21  ;;  %v1134_v32 = vmax.f32 %v1118_v28, 0.0 }
 0x347   :  { %v1448_v24 = vpop.eup %1447 }
 0x348   :  { %v937_v45 = vmul.f32 %v2099_v16, %v917_v60  ;;  %v918_v59 = vmul.f32 %v1448_v24, %v870_v47  ;;  %v1135_v23 = vmax.f32 %v1119_v55, 0.0 }
 0x34a   :  { %v957_v54 = vadd.f32 %v2109_v56, %v937_v45  ;;  %v938_v25 = vmul.f32 %v2099_v16, %v918_v59  ;;  %v1145_v9 = vpack.c.bf16 %v1135_v23, %v1134_v32  ;;  %v1138_v16 = vld [vmem:[%s2272_s7] sm:$0xf] }
 0x34c   :  { %v1120_v41 = vadd.f32 %v1104_v18, %v957_v54  ;;  %v958_v29 = vadd.f32 %v2109_v56, %v938_v25  ;;  %v1169_v35 = vsel %vm677_vm4, %v1145_v9, 0  ;;  %v1217_v56 = vpop.permute.xlu0 %1216 }
 0x34d   :  { %1368 = vmatpush3.bf16.xpose.msra.mxu1 %v1169_v35  ;;  %v1218_v46 = vrot.slane %v1217_v56, 4 }
 0x34e   :  { %v1121_v26 = vadd.f32 %v1105_v5, %v958_v29  ;;  %1369 = vmatprep.subr.bf16.mxu1 %v1449_v21  ;;  %v1136_v17 = vmax.f32 %v1120_v41, 0.0 }
 0x350   :  { %v1137_v42 = vmax.f32 %v1121_v26, 0.0 }
 0x352   :  { %v1146_v53 = vpack.c.bf16 %v1137_v42, %v1136_v17 }
 0x354   :  { %v1172_v8 = vsel %vm677_vm4, %v1146_v53, 0 }
 0x355   :  { %1370 = vmatpush3.bf16.xpose.msra.mxu1 %v1172_v8 }
 0x35c   :  { %1372 = vmatmul.mubr.msk.bf16.vlgmr.msra.gmra.mrb[16].mxu1 %vm677_vm4, %v1138_v16 }
 0x42f   :  { %v1208_v22 = vpop.f32.mrb[16].mxu1 }
 0x430   :  { %v1220_v38 = vadd.f32 %v1218_v46, %v1208_v22  ;;  %v1373_v10 = vpop.f32.mrb[17].mxu1 }
 0x431   :  { %v1211_v36 = vpop.f32.mrb[18].mxu1 }
 0x432   :  { %1221 = vst [vmem:[%s2273_s8] sm:$0x1] %v1220_v38  ;;  %v1374_v21 = vpop.f32.mrb[19].mxu1 }

</bundles_post_ra>
